<compile_context>
chip_gen: v7x
topology: tpu7x:2x2x1
jax: 0.10.0
libtpu: 0.0.40
codegen_flags: <defaults>
</compile_context>

<pallas_src>
import functools
import math
from dataclasses import dataclass

import jax
import jax.numpy as jnp
from jax import lax
from jax.experimental import pallas as pl
from jax.experimental.pallas import tpu as pltpu


# ----------------------------------------------------------------------------
# Config
# ----------------------------------------------------------------------------
@dataclass
class Config:
    d_model: int = 32
    num_heads: int = 4
    num_layers: int = 2
    d_ff: int = 64
    dropout: float = 0.0        # eval mode -> dropout is identity
    patch_size: int = 7
    num_classes: int = 10
    batch_size: int = 2


LN_EPS = 1e-5


# ----------------------------------------------------------------------------
# In-kernel helpers (operate on values, all math in f32)
# ----------------------------------------------------------------------------
def _layer_norm(x, g, b):
    mu = jnp.mean(x, axis=-1, keepdims=True)
    var = jnp.mean((x - mu) * (x - mu), axis=-1, keepdims=True)
    return (x - mu) * lax.rsqrt(var + LN_EPS) * g + b


def _gelu(x):
    # TODO(synk): PyTorch nn.GELU default is exact erf; tanh approximation is
    # used for the TPU EUP path (max abs diff ~1e-3).
    return 0.5 * x * (1.0 + jnp.tanh(0.7978845608028654 * (x + 0.044715 * x * x * x)))


# ----------------------------------------------------------------------------
# Fused forward kernel: one program per image (grid=(B,), "parallel")
# ----------------------------------------------------------------------------
def _fused_forward_kernel(
    xp_ref,                       # (1, S, P2)  flattened patches of one image
    pe_ref,                       # (S, D)      sinusoidal positional encoding
    mask_ref,                     # (H*S, D)    block-diagonal head mask
    patch_w_ref, patch_b_ref,     # (P2, D), (1, D)
    wqkv_ref, bqkv_ref,           # (L, D, 3D), (L, 1, 3D)
    wo_ref, bo_ref,               # (L, D, D),  (L, 1, D)
    w1_ref, b1_ref,               # (L, D, F),  (L, 1, F)
    w2_ref, b2_ref,               # (L, F, D),  (L, 1, D)
    ln1_g_ref, ln1_b_ref,         # (L, 1, D) each
    ln2_g_ref, ln2_b_ref,         # (L, 1, D) each
    cls_ln_g_ref, cls_ln_b_ref,   # (1, D) each
    cls_w1_ref, cls_b1_ref,       # (D, D), (1, D)
    cls_w2_ref, cls_b2_ref,       # (D, C), (1, C)
    out_ref,                      # (1, 1, C)
    *, num_layers, num_heads, seq_len, d_model, scale,
):
    L, H, S, D = num_layers, num_heads, seq_len, d_model

    # ---- patch embedding + positional encoding (fused epilogue) -------------
    x = xp_ref[0]                                             # (S, P2)
    h = (jnp.dot(x, patch_w_ref[...], preferred_element_type=jnp.float32)
         + patch_b_ref[...] + pe_ref[...])                    # (S, D)

    mask = mask_ref[...]                                      # (H*S, D)

    # ---- encoder layers (post-LN), statically unrolled ----------------------
    for l in range(L):
        # fused QKV projection
        qkv = (jnp.dot(h, wqkv_ref[l], preferred_element_type=jnp.float32)
               + bqkv_ref[l])                                 # (S, 3D)
        q = qkv[:, 0:D]
        k = qkv[:, D:2 * D]
        v = qkv[:, 2 * D:3 * D]

        # Heads via block-diagonal mask: tile Q rows per head and zero the
        # columns outside that head, then two full-D matmuls do all heads.
        qh = jnp.concatenate([q] * H, axis=0) * mask          # (H*S, D)
        s = lax.dot_general(qh, k, (((1,), (1,)), ((), ())),
                            preferred_element_type=jnp.float32) * scale  # (H*S, S)

        # softmax (stats in f32, reciprocal on the EUP)
        m = jnp.max(s, axis=-1, keepdims=True)
        p = jnp.exp(s - m)
        denom = jnp.sum(p, axis=-1, keepdims=True)
        p = p * pl.reciprocal(denom, approx=True)

        pv = jnp.dot(p, v, preferred_element_type=jnp.float32)  # (H*S, D)
        masked = pv * mask
        attn = masked[0:S, :]                                  # head 0 columns
        for hh in range(1, H):
            attn = attn + masked[hh * S:(hh + 1) * S, :]       # disjoint cols

        # output projection + residual + LayerNorm1 (fused)
        o = jnp.dot(attn, wo_ref[l], preferred_element_type=jnp.float32) + bo_ref[l]
        h = _layer_norm(h + o, ln1_g_ref[l], ln1_b_ref[l])

        # FFN (w1 -> GELU -> w2) + residual + LayerNorm2 (fused)
        ff = _gelu(jnp.dot(h, w1_ref[l], preferred_element_type=jnp.float32) + b1_ref[l])
        ff = jnp.dot(ff, w2_ref[l], preferred_element_type=jnp.float32) + b2_ref[l]
        h = _layer_norm(h + ff, ln2_g_ref[l], ln2_b_ref[l])

    # ---- mean pool over sequence + classifier head ---------------------------
    pooled = jnp.mean(h, axis=0, keepdims=True)               # (1, D)
    z = _layer_norm(pooled, cls_ln_g_ref[...], cls_ln_b_ref[...])
    z = _gelu(jnp.dot(z, cls_w1_ref[...], preferred_element_type=jnp.float32)
              + cls_b1_ref[...])
    logits = (jnp.dot(z, cls_w2_ref[...], preferred_element_type=jnp.float32)
              + cls_b2_ref[...])                              # (1, C)
    out_ref[0] = logits.astype(out_ref.dtype)


# ----------------------------------------------------------------------------
# Parameter init (xavier_uniform matrices, zero biases, ones/zeros LayerNorm)
# ----------------------------------------------------------------------------
def xavier_uniform(key, fan_in, fan_out, shape):
    bound = math.sqrt(6.0 / (fan_in + fan_out))
    return jax.random.uniform(key, shape, jnp.float32, -bound, bound)


def sinusoidal_pe(seq_len, d_model):
    pos = jnp.arange(seq_len, dtype=jnp.float32)[:, None]
    i = jnp.arange(0, d_model, 2, dtype=jnp.float32)[None, :]
    div = jnp.exp(-math.log(10000.0) * i / d_model)
    pe = jnp.zeros((seq_len, d_model), jnp.float32)
    pe = pe.at[:, 0::2].set(jnp.sin(pos * div))
    pe = pe.at[:, 1::2].set(jnp.cos(pos * div))
    return pe


def init_params(cfg: Config, key, img_size=28, in_channels=1):
    D, H, F, P, C, L = (cfg.d_model, cfg.num_heads, cfg.d_ff,
                        cfg.patch_size, cfg.num_classes, cfg.num_layers)
    patch_dim = in_channels * P * P
    S = (img_size // P) ** 2
    keys = iter(jax.random.split(key, 128))

    p = {}
    p["pe"] = sinusoidal_pe(S, D)                             # (S, D)
    p["patch_w"] = xavier_uniform(next(keys), patch_dim, D, (patch_dim, D))
    p["patch_b"] = jnp.zeros((1, D), jnp.float32)

    wqkv, bqkv, wo, bo, w1, b1, w2, b2 = [], [], [], [], [], [], [], []
    ln1_g, ln1_b, ln2_g, ln2_b = [], [], [], []
    for _ in range(L):
        wq = xavier_uniform(next(keys), D, D, (D, D))
        wk = xavier_uniform(next(keys), D, D, (D, D))
        wv = xavier_uniform(next(keys), D, D, (D, D))
        wqkv.append(jnp.concatenate([wq, wk, wv], axis=1))    # (D, 3D)
        bqkv.append(jnp.zeros((1, 3 * D), jnp.float32))
        wo.append(xavier_uniform(next(keys), D, D, (D, D)))
        bo.append(jnp.zeros((1, D), jnp.float32))
        w1.append(xavier_uniform(next(keys), D, F, (D, F)))
        b1.append(jnp.zeros((1, F), jnp.float32))
        w2.append(xavier_uniform(next(keys), F, D, (F, D)))
        b2.append(jnp.zeros((1, D), jnp.float32))
        ln1_g.append(jnp.ones((1, D), jnp.float32))
        ln1_b.append(jnp.zeros((1, D), jnp.float32))
        ln2_g.append(jnp.ones((1, D), jnp.float32))
        ln2_b.append(jnp.zeros((1, D), jnp.float32))

    p["wqkv"] = jnp.stack(wqkv)       # (L, D, 3D)
    p["bqkv"] = jnp.stack(bqkv)       # (L, 1, 3D)
    p["wo"] = jnp.stack(wo)
    p["bo"] = jnp.stack(bo)
    p["w1"] = jnp.stack(w1)
    p["b1"] = jnp.stack(b1)
    p["w2"] = jnp.stack(w2)
    p["b2"] = jnp.stack(b2)
    p["ln1_g"] = jnp.stack(ln1_g)
    p["ln1_b"] = jnp.stack(ln1_b)
    p["ln2_g"] = jnp.stack(ln2_g)
    p["ln2_b"] = jnp.stack(ln2_b)

    p["cls_ln_g"] = jnp.ones((1, D), jnp.float32)
    p["cls_ln_b"] = jnp.zeros((1, D), jnp.float32)
    p["cls_w1"] = xavier_uniform(next(keys), D, D, (D, D))
    p["cls_b1"] = jnp.zeros((1, D), jnp.float32)
    p["cls_w2"] = xavier_uniform(next(keys), D, C, (D, C))
    p["cls_b2"] = jnp.zeros((1, C), jnp.float32)
    return p


# ----------------------------------------------------------------------------
# Forward pass: patch extraction glue + one fused pallas_call
# ----------------------------------------------------------------------------
def forward(params, x, cfg: Config):
    B, C_in, Himg, Wimg = x.shape
    P, D, H, F, L, C = (cfg.patch_size, cfg.d_model, cfg.num_heads,
                        cfg.d_ff, cfg.num_layers, cfg.num_classes)
    Dh = D // H
    hp, wp = Himg // P, Wimg // P
    S = hp * wp
    P2 = C_in * P * P

    # patch extraction (layout plumbing only): NCHW -> (B, S, C*P*P),
    # channel-major patch flattening to match Conv2d weight layout.
    xp = (x.reshape(B, C_in, hp, P, wp, P)
           .transpose(0, 2, 4, 1, 3, 5)
           .reshape(B, S, P2))

    # block-diagonal head mask (trace-time constant)
    head_mask = (jnp.arange(H * S)[:, None] // S
                 == jnp.arange(D)[None, :] // Dh).astype(jnp.float32)   # (H*S, D)

    # rough cost estimate for the XLA scheduler
    flops_img = (2 * S * P2 * D
                 + L * (2 * S * D * 3 * D + 2 * (H * S) * D * S
                        + 2 * (H * S) * S * D + 2 * S * D * D
                        + 2 * S * D * F + 2 * S * F * D)
                 + 2 * D * D + 2 * D * C)
    trans_img = L * (H * S * S + S * F) + D
    param_bytes = 4 * sum(int(v.size) for k, v in params.items())
    act_bytes = 4 * (B * S * P2 + S * D + H * S * D + B * C)
    cost = pl.CostEstimate(flops=B * flops_img,
                           transcendentals=B * trans_img,
                           bytes_accessed=param_bytes + act_bytes)

    def _f2(shape):
        return pl.BlockSpec(shape, lambda b: (0, 0))

    def _f3(shape):
        return pl.BlockSpec(shape, lambda b: (0, 0, 0))

    in_specs = [
        pl.BlockSpec((1, S, P2), lambda b: (b, 0, 0)),   # xp (per image)
        _f2((S, D)),                                     # pe
        _f2((H * S, D)),                                 # head mask
        _f2((P2, D)), _f2((1, D)),                       # patch embed w, b
        _f3((L, D, 3 * D)), _f3((L, 1, 3 * D)),          # wqkv, bqkv
        _f3((L, D, D)), _f3((L, 1, D)),                  # wo, bo
        _f3((L, D, F)), _f3((L, 1, F)),                  # w1, b1
        _f3((L, F, D)), _f3((L, 1, D)),                  # w2, b2
        _f3((L, 1, D)), _f3((L, 1, D)),                  # ln1 g, b
        _f3((L, 1, D)), _f3((L, 1, D)),                  # ln2 g, b
        _f2((1, D)), _f2((1, D)),                        # cls ln g, b
        _f2((D, D)), _f2((1, D)),                        # cls w1, b1
        _f2((D, C)), _f2((1, C)),                        # cls w2, b2
    ]

    out = pl.pallas_call(
        functools.partial(
            _fused_forward_kernel,
            num_layers=L, num_heads=H, seq_len=S, d_model=D,
            scale=1.0 / math.sqrt(Dh)),
        grid=(B,),
        in_specs=in_specs,
        out_specs=pl.BlockSpec((1, 1, C), lambda b: (b, 0, 0)),
        out_shape=jax.ShapeDtypeStruct((B, 1, C), jnp.float32),
        compiler_params=pltpu.CompilerParams(
            dimension_semantics=("parallel",)),
        cost_estimate=cost,
    )(xp, params["pe"], head_mask,
      params["patch_w"], params["patch_b"],
      params["wqkv"], params["bqkv"],
      params["wo"], params["bo"],
      params["w1"], params["b1"],
      params["w2"], params["b2"],
      params["ln1_g"], params["ln1_b"],
      params["ln2_g"], params["ln2_b"],
      params["cls_ln_g"], params["cls_ln_b"],
      params["cls_w1"], params["cls_b1"],
      params["cls_w2"], params["cls_b2"])

    return out.reshape(B, C)


# ----------------------------------------------------------------------------
if __name__ == "__main__":
    cfg = Config()
    key = jax.random.PRNGKey(0)
    kx, kp = jax.random.split(key)

    # MNIST-like input, NCHW as in the PyTorch module's summary call.
    x = jax.random.normal(kx, (cfg.batch_size, 1, 28, 28), jnp.float32)
    params = init_params(cfg, kp, img_size=28, in_channels=1)

    out = jax.jit(functools.partial(forward, cfg=cfg))(params, x)
    out = jax.block_until_ready(out)
    assert out.shape == (cfg.batch_size, cfg.num_classes), out.shape
    assert jnp.all(jnp.isfinite(out))
    print("KERNEL_OK")
</pallas_src>

<mosaic_0001>
module attributes {stable_mosaic.version = 11 : i64} {
  func.func @_fused_forward_kernel(%arg0: i32, %arg1: memref<1x16x49xf32, #tpu.memory_space<vmem>>, %arg2: memref<16x32xf32, #tpu.memory_space<vmem>>, %arg3: memref<64x32xf32, #tpu.memory_space<vmem>>, %arg4: memref<49x32xf32, #tpu.memory_space<vmem>>, %arg5: memref<1x32xf32, #tpu.memory_space<vmem>>, %arg6: memref<2x32x96xf32, #tpu.memory_space<vmem>>, %arg7: memref<2x1x96xf32, #tpu.memory_space<vmem>>, %arg8: memref<2x32x32xf32, #tpu.memory_space<vmem>>, %arg9: memref<2x1x32xf32, #tpu.memory_space<vmem>>, %arg10: memref<2x32x64xf32, #tpu.memory_space<vmem>>, %arg11: memref<2x1x64xf32, #tpu.memory_space<vmem>>, %arg12: memref<2x64x32xf32, #tpu.memory_space<vmem>>, %arg13: memref<2x1x32xf32, #tpu.memory_space<vmem>>, %arg14: memref<2x1x32xf32, #tpu.memory_space<vmem>>, %arg15: memref<2x1x32xf32, #tpu.memory_space<vmem>>, %arg16: memref<2x1x32xf32, #tpu.memory_space<vmem>>, %arg17: memref<2x1x32xf32, #tpu.memory_space<vmem>>, %arg18: memref<1x32xf32, #tpu.memory_space<vmem>>, %arg19: memref<1x32xf32, #tpu.memory_space<vmem>>, %arg20: memref<32x32xf32, #tpu.memory_space<vmem>>, %arg21: memref<1x32xf32, #tpu.memory_space<vmem>>, %arg22: memref<32x10xf32, #tpu.memory_space<vmem>>, %arg23: memref<1x10xf32, #tpu.memory_space<vmem>>, %arg24: memref<1x1x10xf32, #tpu.memory_space<vmem>>) attributes {dimension_semantics = [#tpu.dimension_semantics<parallel>], iteration_bounds = array<i64: 2>, scalar_prefetch = 0 : i64, scratch_operands = 0 : i64, tpu.core_type = #tpu.core_type<tc>, window_params = [{transform_indices = @transform_0, window_bounds = array<i64: 1, 16, 49>}, {pipeline_mode = #tpu.pipeline_mode<synchronous>, transform_indices = @transform_1, window_bounds = array<i64: 16, 32>}, {pipeline_mode = #tpu.pipeline_mode<synchronous>, transform_indices = @transform_2, window_bounds = array<i64: 64, 32>}, {pipeline_mode = #tpu.pipeline_mode<synchronous>, transform_indices = @transform_3, window_bounds = array<i64: 49, 32>}, {pipeline_mode = #tpu.pipeline_mode<synchronous>, transform_indices = @transform_4, window_bounds = array<i64: 1, 32>}, {pipeline_mode = #tpu.pipeline_mode<synchronous>, transform_indices = @transform_5, window_bounds = array<i64: 2, 32, 96>}, {pipeline_mode = #tpu.pipeline_mode<synchronous>, transform_indices = @transform_6, window_bounds = array<i64: 2, 1, 96>}, {pipeline_mode = #tpu.pipeline_mode<synchronous>, transform_indices = @transform_7, window_bounds = array<i64: 2, 32, 32>}, {pipeline_mode = #tpu.pipeline_mode<synchronous>, transform_indices = @transform_8, window_bounds = array<i64: 2, 1, 32>}, {pipeline_mode = #tpu.pipeline_mode<synchronous>, transform_indices = @transform_9, window_bounds = array<i64: 2, 32, 64>}, {pipeline_mode = #tpu.pipeline_mode<synchronous>, transform_indices = @transform_10, window_bounds = array<i64: 2, 1, 64>}, {pipeline_mode = #tpu.pipeline_mode<synchronous>, transform_indices = @transform_11, window_bounds = array<i64: 2, 64, 32>}, {pipeline_mode = #tpu.pipeline_mode<synchronous>, transform_indices = @transform_12, window_bounds = array<i64: 2, 1, 32>}, {pipeline_mode = #tpu.pipeline_mode<synchronous>, transform_indices = @transform_13, window_bounds = array<i64: 2, 1, 32>}, {pipeline_mode = #tpu.pipeline_mode<synchronous>, transform_indices = @transform_14, window_bounds = array<i64: 2, 1, 32>}, {pipeline_mode = #tpu.pipeline_mode<synchronous>, transform_indices = @transform_15, window_bounds = array<i64: 2, 1, 32>}, {pipeline_mode = #tpu.pipeline_mode<synchronous>, transform_indices = @transform_16, window_bounds = array<i64: 2, 1, 32>}, {pipeline_mode = #tpu.pipeline_mode<synchronous>, transform_indices = @transform_17, window_bounds = array<i64: 1, 32>}, {pipeline_mode = #tpu.pipeline_mode<synchronous>, transform_indices = @transform_18, window_bounds = array<i64: 1, 32>}, {pipeline_mode = #tpu.pipeline_mode<synchronous>, transform_indices = @transform_19, window_bounds = array<i64: 32, 32>}, {pipeline_mode = #tpu.pipeline_mode<synchronous>, transform_indices = @transform_20, window_bounds = array<i64: 1, 32>}, {pipeline_mode = #tpu.pipeline_mode<synchronous>, transform_indices = @transform_21, window_bounds = array<i64: 32, 10>}, {pipeline_mode = #tpu.pipeline_mode<synchronous>, transform_indices = @transform_22, window_bounds = array<i64: 1, 10>}, {transform_indices = @transform_23, window_bounds = array<i64: 1, 1, 10>}]} {
    %c0 = arith.constant 0 : index
    %c0_0 = arith.constant 0 : index
    %c0_1 = arith.constant 0 : index
    %0 = vector.load %arg1[%c0, %c0_0, %c0_1] : memref<1x16x49xf32, #tpu.memory_space<vmem>>, vector<1x16x49xf32>
    %1 = vector.shape_cast %0 : vector<1x16x49xf32> to vector<16x49xf32>
    %c0_2 = arith.constant 0 : index
    %c0_3 = arith.constant 0 : index
    %2 = vector.load %arg4[%c0_2, %c0_3] : memref<49x32xf32, #tpu.memory_space<vmem>>, vector<49x32xf32>
    %cst = arith.constant dense<0.000000e+00> : vector<16x32xf32>
    %3 = tpu.matmul %1, %2, %cst {dimension_numbers = #tpu.dot_dimension_numbers<[1], [0], [0], [1], [0, 0, 1, 1], [], []>} : vector<16x49xf32>, vector<49x32xf32>, vector<16x32xf32> -> vector<16x32xf32>
    %c0_4 = arith.constant 0 : index
    %c0_5 = arith.constant 0 : index
    %4 = vector.load %arg5[%c0_4, %c0_5] : memref<1x32xf32, #tpu.memory_space<vmem>>, vector<1x32xf32>
    %5 = vector.broadcast %4 : vector<1x32xf32> to vector<16x32xf32>
    %6 = arith.addf %3, %5 : vector<16x32xf32>
    %c0_6 = arith.constant 0 : index
    %c0_7 = arith.constant 0 : index
    %7 = vector.load %arg2[%c0_6, %c0_7] : memref<16x32xf32, #tpu.memory_space<vmem>>, vector<16x32xf32>
    %8 = arith.addf %6, %7 : vector<16x32xf32>
    %c0_8 = arith.constant 0 : index
    %c0_9 = arith.constant 0 : index
    %9 = vector.load %arg3[%c0_8, %c0_9] : memref<64x32xf32, #tpu.memory_space<vmem>>, vector<64x32xf32>
    %c0_10 = arith.constant 0 : index
    %c0_11 = arith.constant 0 : index
    %c0_12 = arith.constant 0 : index
    %10 = vector.load %arg6[%c0_10, %c0_11, %c0_12] : memref<2x32x96xf32, #tpu.memory_space<vmem>>, vector<1x32x96xf32>
    %11 = vector.shape_cast %10 : vector<1x32x96xf32> to vector<32x96xf32>
    %cst_13 = arith.constant dense<0.000000e+00> : vector<16x96xf32>
    %12 = tpu.matmul %8, %11, %cst_13 {dimension_numbers = #tpu.dot_dimension_numbers<[1], [0], [0], [1], [0, 0, 1, 1], [], []>} : vector<16x32xf32>, vector<32x96xf32>, vector<16x96xf32> -> vector<16x96xf32>
    %c0_14 = arith.constant 0 : index
    %c0_15 = arith.constant 0 : index
    %c0_16 = arith.constant 0 : index
    %13 = vector.load %arg7[%c0_14, %c0_15, %c0_16] : memref<2x1x96xf32, #tpu.memory_space<vmem>>, vector<1x1x96xf32>
    %14 = vector.shape_cast %13 : vector<1x1x96xf32> to vector<1x96xf32>
    %15 = vector.broadcast %14 : vector<1x96xf32> to vector<16x96xf32>
    %16 = arith.addf %12, %15 : vector<16x96xf32>
    %17 = vector.extract_strided_slice %16 {offsets = [0, 0], sizes = [16, 32], strides = [1, 1]} : vector<16x96xf32> to vector<16x32xf32>
    %18 = vector.extract_strided_slice %16 {offsets = [0, 32], sizes = [16, 32], strides = [1, 1]} : vector<16x96xf32> to vector<16x32xf32>
    %19 = vector.extract_strided_slice %16 {offsets = [0, 64], sizes = [16, 32], strides = [1, 1]} : vector<16x96xf32> to vector<16x32xf32>
    %20 = tpu.concatenate %17, %17, %17, %17 in 0 : vector<16x32xf32>, vector<16x32xf32>, vector<16x32xf32>, vector<16x32xf32> -> vector<64x32xf32>
    %21 = arith.mulf %20, %9 : vector<64x32xf32>
    %cst_17 = arith.constant dense<0.000000e+00> : vector<64x16xf32>
    %22 = tpu.matmul %21, %18, %cst_17 {dimension_numbers = #tpu.dot_dimension_numbers<[1], [1], [0], [0], [0, 0, 1, 0], [], []>} : vector<64x32xf32>, vector<16x32xf32>, vector<64x16xf32> -> vector<64x16xf32>
    %cst_18 = arith.constant 0.353553385 : f32
    %23 = vector.broadcast %cst_18 : f32 to vector<64x16xf32>
    %24 = arith.mulf %22, %23 : vector<64x16xf32>
    %cst_19 = arith.constant dense<0xFF800000> : vector<64xf32>
    %25 = vector.multi_reduction <maximumf>, %24, %cst_19 [1] : vector<64x16xf32> to vector<64xf32>
    %26 = vector.shape_cast %25 : vector<64xf32> to vector<64x1xf32>
    %27 = vector.broadcast %26 : vector<64x1xf32> to vector<64x16xf32>
    %28 = arith.subf %24, %27 : vector<64x16xf32>
    %29 = math.exp %28 : vector<64x16xf32>
    %cst_20 = arith.constant dense<0.000000e+00> : vector<64xf32>
    %30 = vector.multi_reduction <add>, %29, %cst_20 [1] : vector<64x16xf32> to vector<64xf32>
    %31 = vector.shape_cast %30 : vector<64xf32> to vector<64x1xf32>
    %32 = tpu.reciprocal %31 {approx = true} : vector<64x1xf32> -> vector<64x1xf32>
    %33 = vector.broadcast %32 : vector<64x1xf32> to vector<64x16xf32>
    %34 = arith.mulf %29, %33 : vector<64x16xf32>
    %cst_21 = arith.constant dense<0.000000e+00> : vector<64x32xf32>
    %35 = tpu.matmul %34, %19, %cst_21 {dimension_numbers = #tpu.dot_dimension_numbers<[1], [0], [0], [1], [0, 0, 1, 1], [], []>} : vector<64x16xf32>, vector<16x32xf32>, vector<64x32xf32> -> vector<64x32xf32>
    %36 = arith.mulf %35, %9 : vector<64x32xf32>
    %37 = vector.extract_strided_slice %36 {offsets = [0, 0], sizes = [16, 32], strides = [1, 1]} : vector<64x32xf32> to vector<16x32xf32>
    %38 = vector.extract_strided_slice %36 {offsets = [16, 0], sizes = [16, 32], strides = [1, 1]} : vector<64x32xf32> to vector<16x32xf32>
    %39 = arith.addf %37, %38 : vector<16x32xf32>
    %40 = vector.extract_strided_slice %36 {offsets = [32, 0], sizes = [16, 32], strides = [1, 1]} : vector<64x32xf32> to vector<16x32xf32>
    %41 = arith.addf %39, %40 : vector<16x32xf32>
    %42 = vector.extract_strided_slice %36 {offsets = [48, 0], sizes = [16, 32], strides = [1, 1]} : vector<64x32xf32> to vector<16x32xf32>
    %43 = arith.addf %41, %42 : vector<16x32xf32>
    %c0_22 = arith.constant 0 : index
    %c0_23 = arith.constant 0 : index
    %c0_24 = arith.constant 0 : index
    %44 = vector.load %arg8[%c0_22, %c0_23, %c0_24] : memref<2x32x32xf32, #tpu.memory_space<vmem>>, vector<1x32x32xf32>
    %45 = vector.shape_cast %44 : vector<1x32x32xf32> to vector<32x32xf32>
    %cst_25 = arith.constant dense<0.000000e+00> : vector<16x32xf32>
    %46 = tpu.matmul %43, %45, %cst_25 {dimension_numbers = #tpu.dot_dimension_numbers<[1], [0], [0], [1], [0, 0, 1, 1], [], []>} : vector<16x32xf32>, vector<32x32xf32>, vector<16x32xf32> -> vector<16x32xf32>
    %c0_26 = arith.constant 0 : index
    %c0_27 = arith.constant 0 : index
    %c0_28 = arith.constant 0 : index
    %47 = vector.load %arg9[%c0_26, %c0_27, %c0_28] : memref<2x1x32xf32, #tpu.memory_space<vmem>>, vector<1x1x32xf32>
    %48 = vector.shape_cast %47 : vector<1x1x32xf32> to vector<1x32xf32>
    %49 = vector.broadcast %48 : vector<1x32xf32> to vector<16x32xf32>
    %50 = arith.addf %46, %49 : vector<16x32xf32>
    %51 = arith.addf %8, %50 : vector<16x32xf32>
    %c0_29 = arith.constant 0 : index
    %c0_30 = arith.constant 0 : index
    %c0_31 = arith.constant 0 : index
    %52 = vector.load %arg14[%c0_29, %c0_30, %c0_31] : memref<2x1x32xf32, #tpu.memory_space<vmem>>, vector<1x1x32xf32>
    %53 = vector.shape_cast %52 : vector<1x1x32xf32> to vector<1x32xf32>
    %c0_32 = arith.constant 0 : index
    %c0_33 = arith.constant 0 : index
    %c0_34 = arith.constant 0 : index
    %54 = vector.load %arg15[%c0_32, %c0_33, %c0_34] : memref<2x1x32xf32, #tpu.memory_space<vmem>>, vector<1x1x32xf32>
    %55 = vector.shape_cast %54 : vector<1x1x32xf32> to vector<1x32xf32>
    %cst_35 = arith.constant dense<0.000000e+00> : vector<16xf32>
    %56 = vector.multi_reduction <add>, %51, %cst_35 [1] : vector<16x32xf32> to vector<16xf32>
    %57 = vector.shape_cast %56 : vector<16xf32> to vector<16x1xf32>
    %cst_36 = arith.constant 3.200000e+01 : f32
    %58 = vector.broadcast %cst_36 : f32 to vector<16x1xf32>
    %59 = arith.divf %57, %58 : vector<16x1xf32>
    %60 = vector.broadcast %59 : vector<16x1xf32> to vector<16x32xf32>
    %61 = arith.subf %51, %60 : vector<16x32xf32>
    %62 = vector.broadcast %59 : vector<16x1xf32> to vector<16x32xf32>
    %63 = arith.subf %51, %62 : vector<16x32xf32>
    %64 = arith.mulf %61, %63 : vector<16x32xf32>
    %cst_37 = arith.constant dense<0.000000e+00> : vector<16xf32>
    %65 = vector.multi_reduction <add>, %64, %cst_37 [1] : vector<16x32xf32> to vector<16xf32>
    %66 = vector.shape_cast %65 : vector<16xf32> to vector<16x1xf32>
    %cst_38 = arith.constant 3.200000e+01 : f32
    %67 = vector.broadcast %cst_38 : f32 to vector<16x1xf32>
    %68 = arith.divf %66, %67 : vector<16x1xf32>
    %69 = vector.broadcast %59 : vector<16x1xf32> to vector<16x32xf32>
    %70 = arith.subf %51, %69 : vector<16x32xf32>
    %cst_39 = arith.constant 9.99999974E-6 : f32
    %71 = vector.broadcast %cst_39 : f32 to vector<16x1xf32>
    %72 = arith.addf %68, %71 : vector<16x1xf32>
    %73 = math.rsqrt %72 : vector<16x1xf32>
    %74 = vector.broadcast %73 : vector<16x1xf32> to vector<16x32xf32>
    %75 = arith.mulf %70, %74 : vector<16x32xf32>
    %76 = vector.broadcast %53 : vector<1x32xf32> to vector<16x32xf32>
    %77 = arith.mulf %75, %76 : vector<16x32xf32>
    %78 = vector.broadcast %55 : vector<1x32xf32> to vector<16x32xf32>
    %79 = arith.addf %77, %78 : vector<16x32xf32>
    %c0_40 = arith.constant 0 : index
    %c0_41 = arith.constant 0 : index
    %c0_42 = arith.constant 0 : index
    %80 = vector.load %arg10[%c0_40, %c0_41, %c0_42] : memref<2x32x64xf32, #tpu.memory_space<vmem>>, vector<1x32x64xf32>
    %81 = vector.shape_cast %80 : vector<1x32x64xf32> to vector<32x64xf32>
    %cst_43 = arith.constant dense<0.000000e+00> : vector<16x64xf32>
    %82 = tpu.matmul %79, %81, %cst_43 {dimension_numbers = #tpu.dot_dimension_numbers<[1], [0], [0], [1], [0, 0, 1, 1], [], []>} : vector<16x32xf32>, vector<32x64xf32>, vector<16x64xf32> -> vector<16x64xf32>
    %c0_44 = arith.constant 0 : index
    %c0_45 = arith.constant 0 : index
    %c0_46 = arith.constant 0 : index
    %83 = vector.load %arg11[%c0_44, %c0_45, %c0_46] : memref<2x1x64xf32, #tpu.memory_space<vmem>>, vector<1x1x64xf32>
    %84 = vector.shape_cast %83 : vector<1x1x64xf32> to vector<1x64xf32>
    %85 = vector.broadcast %84 : vector<1x64xf32> to vector<16x64xf32>
    %86 = arith.addf %82, %85 : vector<16x64xf32>
    %cst_47 = arith.constant 5.000000e-01 : f32
    %87 = vector.broadcast %cst_47 : f32 to vector<16x64xf32>
    %88 = arith.mulf %87, %86 : vector<16x64xf32>
    %cst_48 = arith.constant 4.471500e-02 : f32
    %89 = vector.broadcast %cst_48 : f32 to vector<16x64xf32>
    %90 = arith.mulf %89, %86 : vector<16x64xf32>
    %91 = arith.mulf %90, %86 : vector<16x64xf32>
    %92 = arith.mulf %91, %86 : vector<16x64xf32>
    %93 = arith.addf %86, %92 : vector<16x64xf32>
    %cst_49 = arith.constant 0.797884583 : f32
    %94 = vector.broadcast %cst_49 : f32 to vector<16x64xf32>
    %95 = arith.mulf %94, %93 : vector<16x64xf32>
    %96 = math.tanh %95 : vector<16x64xf32>
    %cst_50 = arith.constant 1.000000e+00 : f32
    %97 = vector.broadcast %cst_50 : f32 to vector<16x64xf32>
    %98 = arith.addf %97, %96 : vector<16x64xf32>
    %99 = arith.mulf %88, %98 : vector<16x64xf32>
    %c0_51 = arith.constant 0 : index
    %c0_52 = arith.constant 0 : index
    %c0_53 = arith.constant 0 : index
    %100 = vector.load %arg12[%c0_51, %c0_52, %c0_53] : memref<2x64x32xf32, #tpu.memory_space<vmem>>, vector<1x64x32xf32>
    %101 = vector.shape_cast %100 : vector<1x64x32xf32> to vector<64x32xf32>
    %cst_54 = arith.constant dense<0.000000e+00> : vector<16x32xf32>
    %102 = tpu.matmul %99, %101, %cst_54 {dimension_numbers = #tpu.dot_dimension_numbers<[1], [0], [0], [1], [0, 0, 1, 1], [], []>} : vector<16x64xf32>, vector<64x32xf32>, vector<16x32xf32> -> vector<16x32xf32>
    %c0_55 = arith.constant 0 : index
    %c0_56 = arith.constant 0 : index
    %c0_57 = arith.constant 0 : index
    %103 = vector.load %arg13[%c0_55, %c0_56, %c0_57] : memref<2x1x32xf32, #tpu.memory_space<vmem>>, vector<1x1x32xf32>
    %104 = vector.shape_cast %103 : vector<1x1x32xf32> to vector<1x32xf32>
    %105 = vector.broadcast %104 : vector<1x32xf32> to vector<16x32xf32>
    %106 = arith.addf %102, %105 : vector<16x32xf32>
    %107 = arith.addf %79, %106 : vector<16x32xf32>
    %c0_58 = arith.constant 0 : index
    %c0_59 = arith.constant 0 : index
    %c0_60 = arith.constant 0 : index
    %108 = vector.load %arg16[%c0_58, %c0_59, %c0_60] : memref<2x1x32xf32, #tpu.memory_space<vmem>>, vector<1x1x32xf32>
    %109 = vector.shape_cast %108 : vector<1x1x32xf32> to vector<1x32xf32>
    %c0_61 = arith.constant 0 : index
    %c0_62 = arith.constant 0 : index
    %c0_63 = arith.constant 0 : index
    %110 = vector.load %arg17[%c0_61, %c0_62, %c0_63] : memref<2x1x32xf32, #tpu.memory_space<vmem>>, vector<1x1x32xf32>
    %111 = vector.shape_cast %110 : vector<1x1x32xf32> to vector<1x32xf32>
    %cst_64 = arith.constant dense<0.000000e+00> : vector<16xf32>
    %112 = vector.multi_reduction <add>, %107, %cst_64 [1] : vector<16x32xf32> to vector<16xf32>
    %113 = vector.shape_cast %112 : vector<16xf32> to vector<16x1xf32>
    %cst_65 = arith.constant 3.200000e+01 : f32
    %114 = vector.broadcast %cst_65 : f32 to vector<16x1xf32>
    %115 = arith.divf %113, %114 : vector<16x1xf32>
    %116 = vector.broadcast %115 : vector<16x1xf32> to vector<16x32xf32>
    %117 = arith.subf %107, %116 : vector<16x32xf32>
    %118 = vector.broadcast %115 : vector<16x1xf32> to vector<16x32xf32>
    %119 = arith.subf %107, %118 : vector<16x32xf32>
    %120 = arith.mulf %117, %119 : vector<16x32xf32>
    %cst_66 = arith.constant dense<0.000000e+00> : vector<16xf32>
    %121 = vector.multi_reduction <add>, %120, %cst_66 [1] : vector<16x32xf32> to vector<16xf32>
    %122 = vector.shape_cast %121 : vector<16xf32> to vector<16x1xf32>
    %cst_67 = arith.constant 3.200000e+01 : f32
    %123 = vector.broadcast %cst_67 : f32 to vector<16x1xf32>
    %124 = arith.divf %122, %123 : vector<16x1xf32>
    %125 = vector.broadcast %115 : vector<16x1xf32> to vector<16x32xf32>
    %126 = arith.subf %107, %125 : vector<16x32xf32>
    %cst_68 = arith.constant 9.99999974E-6 : f32
    %127 = vector.broadcast %cst_68 : f32 to vector<16x1xf32>
    %128 = arith.addf %124, %127 : vector<16x1xf32>
    %129 = math.rsqrt %128 : vector<16x1xf32>
    %130 = vector.broadcast %129 : vector<16x1xf32> to vector<16x32xf32>
    %131 = arith.mulf %126, %130 : vector<16x32xf32>
    %132 = vector.broadcast %109 : vector<1x32xf32> to vector<16x32xf32>
    %133 = arith.mulf %131, %132 : vector<16x32xf32>
    %134 = vector.broadcast %111 : vector<1x32xf32> to vector<16x32xf32>
    %135 = arith.addf %133, %134 : vector<16x32xf32>
    %c1 = arith.constant 1 : index
    %c0_69 = arith.constant 0 : index
    %c0_70 = arith.constant 0 : index
    %136 = vector.load %arg6[%c1, %c0_69, %c0_70] : memref<2x32x96xf32, #tpu.memory_space<vmem>>, vector<1x32x96xf32>
    %137 = vector.shape_cast %136 : vector<1x32x96xf32> to vector<32x96xf32>
    %cst_71 = arith.constant dense<0.000000e+00> : vector<16x96xf32>
    %138 = tpu.matmul %135, %137, %cst_71 {dimension_numbers = #tpu.dot_dimension_numbers<[1], [0], [0], [1], [0, 0, 1, 1], [], []>} : vector<16x32xf32>, vector<32x96xf32>, vector<16x96xf32> -> vector<16x96xf32>
    %c1_72 = arith.constant 1 : index
    %c0_73 = arith.constant 0 : index
    %c0_74 = arith.constant 0 : index
    %139 = vector.load %arg7[%c1_72, %c0_73, %c0_74] : memref<2x1x96xf32, #tpu.memory_space<vmem>>, vector<1x1x96xf32>
    %140 = vector.shape_cast %139 : vector<1x1x96xf32> to vector<1x96xf32>
    %141 = vector.broadcast %140 : vector<1x96xf32> to vector<16x96xf32>
    %142 = arith.addf %138, %141 : vector<16x96xf32>
    %143 = vector.extract_strided_slice %142 {offsets = [0, 0], sizes = [16, 32], strides = [1, 1]} : vector<16x96xf32> to vector<16x32xf32>
    %144 = vector.extract_strided_slice %142 {offsets = [0, 32], sizes = [16, 32], strides = [1, 1]} : vector<16x96xf32> to vector<16x32xf32>
    %145 = vector.extract_strided_slice %142 {offsets = [0, 64], sizes = [16, 32], strides = [1, 1]} : vector<16x96xf32> to vector<16x32xf32>
    %146 = tpu.concatenate %143, %143, %143, %143 in 0 : vector<16x32xf32>, vector<16x32xf32>, vector<16x32xf32>, vector<16x32xf32> -> vector<64x32xf32>
    %147 = arith.mulf %146, %9 : vector<64x32xf32>
    %cst_75 = arith.constant dense<0.000000e+00> : vector<64x16xf32>
    %148 = tpu.matmul %147, %144, %cst_75 {dimension_numbers = #tpu.dot_dimension_numbers<[1], [1], [0], [0], [0, 0, 1, 0], [], []>} : vector<64x32xf32>, vector<16x32xf32>, vector<64x16xf32> -> vector<64x16xf32>
    %cst_76 = arith.constant 0.353553385 : f32
    %149 = vector.broadcast %cst_76 : f32 to vector<64x16xf32>
    %150 = arith.mulf %148, %149 : vector<64x16xf32>
    %cst_77 = arith.constant dense<0xFF800000> : vector<64xf32>
    %151 = vector.multi_reduction <maximumf>, %150, %cst_77 [1] : vector<64x16xf32> to vector<64xf32>
    %152 = vector.shape_cast %151 : vector<64xf32> to vector<64x1xf32>
    %153 = vector.broadcast %152 : vector<64x1xf32> to vector<64x16xf32>
    %154 = arith.subf %150, %153 : vector<64x16xf32>
    %155 = math.exp %154 : vector<64x16xf32>
    %cst_78 = arith.constant dense<0.000000e+00> : vector<64xf32>
    %156 = vector.multi_reduction <add>, %155, %cst_78 [1] : vector<64x16xf32> to vector<64xf32>
    %157 = vector.shape_cast %156 : vector<64xf32> to vector<64x1xf32>
    %158 = tpu.reciprocal %157 {approx = true} : vector<64x1xf32> -> vector<64x1xf32>
    %159 = vector.broadcast %158 : vector<64x1xf32> to vector<64x16xf32>
    %160 = arith.mulf %155, %159 : vector<64x16xf32>
    %cst_79 = arith.constant dense<0.000000e+00> : vector<64x32xf32>
    %161 = tpu.matmul %160, %145, %cst_79 {dimension_numbers = #tpu.dot_dimension_numbers<[1], [0], [0], [1], [0, 0, 1, 1], [], []>} : vector<64x16xf32>, vector<16x32xf32>, vector<64x32xf32> -> vector<64x32xf32>
    %162 = arith.mulf %161, %9 : vector<64x32xf32>
    %163 = vector.extract_strided_slice %162 {offsets = [0, 0], sizes = [16, 32], strides = [1, 1]} : vector<64x32xf32> to vector<16x32xf32>
    %164 = vector.extract_strided_slice %162 {offsets = [16, 0], sizes = [16, 32], strides = [1, 1]} : vector<64x32xf32> to vector<16x32xf32>
    %165 = arith.addf %163, %164 : vector<16x32xf32>
    %166 = vector.extract_strided_slice %162 {offsets = [32, 0], sizes = [16, 32], strides = [1, 1]} : vector<64x32xf32> to vector<16x32xf32>
    %167 = arith.addf %165, %166 : vector<16x32xf32>
    %168 = vector.extract_strided_slice %162 {offsets = [48, 0], sizes = [16, 32], strides = [1, 1]} : vector<64x32xf32> to vector<16x32xf32>
    %169 = arith.addf %167, %168 : vector<16x32xf32>
    %c1_80 = arith.constant 1 : index
    %c0_81 = arith.constant 0 : index
    %c0_82 = arith.constant 0 : index
    %170 = vector.load %arg8[%c1_80, %c0_81, %c0_82] : memref<2x32x32xf32, #tpu.memory_space<vmem>>, vector<1x32x32xf32>
    %171 = vector.shape_cast %170 : vector<1x32x32xf32> to vector<32x32xf32>
    %cst_83 = arith.constant dense<0.000000e+00> : vector<16x32xf32>
    %172 = tpu.matmul %169, %171, %cst_83 {dimension_numbers = #tpu.dot_dimension_numbers<[1], [0], [0], [1], [0, 0, 1, 1], [], []>} : vector<16x32xf32>, vector<32x32xf32>, vector<16x32xf32> -> vector<16x32xf32>
    %c1_84 = arith.constant 1 : index
    %c0_85 = arith.constant 0 : index
    %c0_86 = arith.constant 0 : index
    %173 = vector.load %arg9[%c1_84, %c0_85, %c0_86] : memref<2x1x32xf32, #tpu.memory_space<vmem>>, vector<1x1x32xf32>
    %174 = vector.shape_cast %173 : vector<1x1x32xf32> to vector<1x32xf32>
    %175 = vector.broadcast %174 : vector<1x32xf32> to vector<16x32xf32>
    %176 = arith.addf %172, %175 : vector<16x32xf32>
    %177 = arith.addf %135, %176 : vector<16x32xf32>
    %c1_87 = arith.constant 1 : index
    %c0_88 = arith.constant 0 : index
    %c0_89 = arith.constant 0 : index
    %178 = vector.load %arg14[%c1_87, %c0_88, %c0_89] : memref<2x1x32xf32, #tpu.memory_space<vmem>>, vector<1x1x32xf32>
    %179 = vector.shape_cast %178 : vector<1x1x32xf32> to vector<1x32xf32>
    %c1_90 = arith.constant 1 : index
    %c0_91 = arith.constant 0 : index
    %c0_92 = arith.constant 0 : index
    %180 = vector.load %arg15[%c1_90, %c0_91, %c0_92] : memref<2x1x32xf32, #tpu.memory_space<vmem>>, vector<1x1x32xf32>
    %181 = vector.shape_cast %180 : vector<1x1x32xf32> to vector<1x32xf32>
    %cst_93 = arith.constant dense<0.000000e+00> : vector<16xf32>
    %182 = vector.multi_reduction <add>, %177, %cst_93 [1] : vector<16x32xf32> to vector<16xf32>
    %183 = vector.shape_cast %182 : vector<16xf32> to vector<16x1xf32>
    %cst_94 = arith.constant 3.200000e+01 : f32
    %184 = vector.broadcast %cst_94 : f32 to vector<16x1xf32>
    %185 = arith.divf %183, %184 : vector<16x1xf32>
    %186 = vector.broadcast %185 : vector<16x1xf32> to vector<16x32xf32>
    %187 = arith.subf %177, %186 : vector<16x32xf32>
    %188 = vector.broadcast %185 : vector<16x1xf32> to vector<16x32xf32>
    %189 = arith.subf %177, %188 : vector<16x32xf32>
    %190 = arith.mulf %187, %189 : vector<16x32xf32>
    %cst_95 = arith.constant dense<0.000000e+00> : vector<16xf32>
    %191 = vector.multi_reduction <add>, %190, %cst_95 [1] : vector<16x32xf32> to vector<16xf32>
    %192 = vector.shape_cast %191 : vector<16xf32> to vector<16x1xf32>
    %cst_96 = arith.constant 3.200000e+01 : f32
    %193 = vector.broadcast %cst_96 : f32 to vector<16x1xf32>
    %194 = arith.divf %192, %193 : vector<16x1xf32>
    %195 = vector.broadcast %185 : vector<16x1xf32> to vector<16x32xf32>
    %196 = arith.subf %177, %195 : vector<16x32xf32>
    %cst_97 = arith.constant 9.99999974E-6 : f32
    %197 = vector.broadcast %cst_97 : f32 to vector<16x1xf32>
    %198 = arith.addf %194, %197 : vector<16x1xf32>
    %199 = math.rsqrt %198 : vector<16x1xf32>
    %200 = vector.broadcast %199 : vector<16x1xf32> to vector<16x32xf32>
    %201 = arith.mulf %196, %200 : vector<16x32xf32>
    %202 = vector.broadcast %179 : vector<1x32xf32> to vector<16x32xf32>
    %203 = arith.mulf %201, %202 : vector<16x32xf32>
    %204 = vector.broadcast %181 : vector<1x32xf32> to vector<16x32xf32>
    %205 = arith.addf %203, %204 : vector<16x32xf32>
    %c1_98 = arith.constant 1 : index
    %c0_99 = arith.constant 0 : index
    %c0_100 = arith.constant 0 : index
    %206 = vector.load %arg10[%c1_98, %c0_99, %c0_100] : memref<2x32x64xf32, #tpu.memory_space<vmem>>, vector<1x32x64xf32>
    %207 = vector.shape_cast %206 : vector<1x32x64xf32> to vector<32x64xf32>
    %cst_101 = arith.constant dense<0.000000e+00> : vector<16x64xf32>
    %208 = tpu.matmul %205, %207, %cst_101 {dimension_numbers = #tpu.dot_dimension_numbers<[1], [0], [0], [1], [0, 0, 1, 1], [], []>} : vector<16x32xf32>, vector<32x64xf32>, vector<16x64xf32> -> vector<16x64xf32>
    %c1_102 = arith.constant 1 : index
    %c0_103 = arith.constant 0 : index
    %c0_104 = arith.constant 0 : index
    %209 = vector.load %arg11[%c1_102, %c0_103, %c0_104] : memref<2x1x64xf32, #tpu.memory_space<vmem>>, vector<1x1x64xf32>
    %210 = vector.shape_cast %209 : vector<1x1x64xf32> to vector<1x64xf32>
    %211 = vector.broadcast %210 : vector<1x64xf32> to vector<16x64xf32>
    %212 = arith.addf %208, %211 : vector<16x64xf32>
    %cst_105 = arith.constant 5.000000e-01 : f32
    %213 = vector.broadcast %cst_105 : f32 to vector<16x64xf32>
    %214 = arith.mulf %213, %212 : vector<16x64xf32>
    %cst_106 = arith.constant 4.471500e-02 : f32
    %215 = vector.broadcast %cst_106 : f32 to vector<16x64xf32>
    %216 = arith.mulf %215, %212 : vector<16x64xf32>
    %217 = arith.mulf %216, %212 : vector<16x64xf32>
    %218 = arith.mulf %217, %212 : vector<16x64xf32>
    %219 = arith.addf %212, %218 : vector<16x64xf32>
    %cst_107 = arith.constant 0.797884583 : f32
    %220 = vector.broadcast %cst_107 : f32 to vector<16x64xf32>
    %221 = arith.mulf %220, %219 : vector<16x64xf32>
    %222 = math.tanh %221 : vector<16x64xf32>
    %cst_108 = arith.constant 1.000000e+00 : f32
    %223 = vector.broadcast %cst_108 : f32 to vector<16x64xf32>
    %224 = arith.addf %223, %222 : vector<16x64xf32>
    %225 = arith.mulf %214, %224 : vector<16x64xf32>
    %c1_109 = arith.constant 1 : index
    %c0_110 = arith.constant 0 : index
    %c0_111 = arith.constant 0 : index
    %226 = vector.load %arg12[%c1_109, %c0_110, %c0_111] : memref<2x64x32xf32, #tpu.memory_space<vmem>>, vector<1x64x32xf32>
    %227 = vector.shape_cast %226 : vector<1x64x32xf32> to vector<64x32xf32>
    %cst_112 = arith.constant dense<0.000000e+00> : vector<16x32xf32>
    %228 = tpu.matmul %225, %227, %cst_112 {dimension_numbers = #tpu.dot_dimension_numbers<[1], [0], [0], [1], [0, 0, 1, 1], [], []>} : vector<16x64xf32>, vector<64x32xf32>, vector<16x32xf32> -> vector<16x32xf32>
    %c1_113 = arith.constant 1 : index
    %c0_114 = arith.constant 0 : index
    %c0_115 = arith.constant 0 : index
    %229 = vector.load %arg13[%c1_113, %c0_114, %c0_115] : memref<2x1x32xf32, #tpu.memory_space<vmem>>, vector<1x1x32xf32>
    %230 = vector.shape_cast %229 : vector<1x1x32xf32> to vector<1x32xf32>
    %231 = vector.broadcast %230 : vector<1x32xf32> to vector<16x32xf32>
    %232 = arith.addf %228, %231 : vector<16x32xf32>
    %233 = arith.addf %205, %232 : vector<16x32xf32>
    %c1_116 = arith.constant 1 : index
    %c0_117 = arith.constant 0 : index
    %c0_118 = arith.constant 0 : index
    %234 = vector.load %arg16[%c1_116, %c0_117, %c0_118] : memref<2x1x32xf32, #tpu.memory_space<vmem>>, vector<1x1x32xf32>
    %235 = vector.shape_cast %234 : vector<1x1x32xf32> to vector<1x32xf32>
    %c1_119 = arith.constant 1 : index
    %c0_120 = arith.constant 0 : index
    %c0_121 = arith.constant 0 : index
    %236 = vector.load %arg17[%c1_119, %c0_120, %c0_121] : memref<2x1x32xf32, #tpu.memory_space<vmem>>, vector<1x1x32xf32>
    %237 = vector.shape_cast %236 : vector<1x1x32xf32> to vector<1x32xf32>
    %cst_122 = arith.constant dense<0.000000e+00> : vector<16xf32>
    %238 = vector.multi_reduction <add>, %233, %cst_122 [1] : vector<16x32xf32> to vector<16xf32>
    %239 = vector.shape_cast %238 : vector<16xf32> to vector<16x1xf32>
    %cst_123 = arith.constant 3.200000e+01 : f32
    %240 = vector.broadcast %cst_123 : f32 to vector<16x1xf32>
    %241 = arith.divf %239, %240 : vector<16x1xf32>
    %242 = vector.broadcast %241 : vector<16x1xf32> to vector<16x32xf32>
    %243 = arith.subf %233, %242 : vector<16x32xf32>
    %244 = vector.broadcast %241 : vector<16x1xf32> to vector<16x32xf32>
    %245 = arith.subf %233, %244 : vector<16x32xf32>
    %246 = arith.mulf %243, %245 : vector<16x32xf32>
    %cst_124 = arith.constant dense<0.000000e+00> : vector<16xf32>
    %247 = vector.multi_reduction <add>, %246, %cst_124 [1] : vector<16x32xf32> to vector<16xf32>
    %248 = vector.shape_cast %247 : vector<16xf32> to vector<16x1xf32>
    %cst_125 = arith.constant 3.200000e+01 : f32
    %249 = vector.broadcast %cst_125 : f32 to vector<16x1xf32>
    %250 = arith.divf %248, %249 : vector<16x1xf32>
    %251 = vector.broadcast %241 : vector<16x1xf32> to vector<16x32xf32>
    %252 = arith.subf %233, %251 : vector<16x32xf32>
    %cst_126 = arith.constant 9.99999974E-6 : f32
    %253 = vector.broadcast %cst_126 : f32 to vector<16x1xf32>
    %254 = arith.addf %250, %253 : vector<16x1xf32>
    %255 = math.rsqrt %254 : vector<16x1xf32>
    %256 = vector.broadcast %255 : vector<16x1xf32> to vector<16x32xf32>
    %257 = arith.mulf %252, %256 : vector<16x32xf32>
    %258 = vector.broadcast %235 : vector<1x32xf32> to vector<16x32xf32>
    %259 = arith.mulf %257, %258 : vector<16x32xf32>
    %260 = vector.broadcast %237 : vector<1x32xf32> to vector<16x32xf32>
    %261 = arith.addf %259, %260 : vector<16x32xf32>
    %cst_127 = arith.constant dense<0.000000e+00> : vector<32xf32>
    %262 = vector.multi_reduction <add>, %261, %cst_127 [0] : vector<16x32xf32> to vector<32xf32>
    %263 = vector.shape_cast %262 : vector<32xf32> to vector<1x32xf32>
    %cst_128 = arith.constant 1.600000e+01 : f32
    %264 = vector.broadcast %cst_128 : f32 to vector<1x32xf32>
    %265 = arith.divf %263, %264 : vector<1x32xf32>
    %c0_129 = arith.constant 0 : index
    %c0_130 = arith.constant 0 : index
    %266 = vector.load %arg18[%c0_129, %c0_130] : memref<1x32xf32, #tpu.memory_space<vmem>>, vector<1x32xf32>
    %c0_131 = arith.constant 0 : index
    %c0_132 = arith.constant 0 : index
    %267 = vector.load %arg19[%c0_131, %c0_132] : memref<1x32xf32, #tpu.memory_space<vmem>>, vector<1x32xf32>
    %cst_133 = arith.constant dense<0.000000e+00> : vector<1xf32>
    %268 = vector.multi_reduction <add>, %265, %cst_133 [1] : vector<1x32xf32> to vector<1xf32>
    %269 = vector.shape_cast %268 : vector<1xf32> to vector<1x1xf32>
    %cst_134 = arith.constant 3.200000e+01 : f32
    %270 = vector.broadcast %cst_134 : f32 to vector<1x1xf32>
    %271 = arith.divf %269, %270 : vector<1x1xf32>
    %272 = vector.broadcast %271 : vector<1x1xf32> to vector<1x32xf32>
    %273 = arith.subf %265, %272 : vector<1x32xf32>
    %274 = vector.broadcast %271 : vector<1x1xf32> to vector<1x32xf32>
    %275 = arith.subf %265, %274 : vector<1x32xf32>
    %276 = arith.mulf %273, %275 : vector<1x32xf32>
    %cst_135 = arith.constant dense<0.000000e+00> : vector<1xf32>
    %277 = vector.multi_reduction <add>, %276, %cst_135 [1] : vector<1x32xf32> to vector<1xf32>
    %278 = vector.shape_cast %277 : vector<1xf32> to vector<1x1xf32>
    %cst_136 = arith.constant 3.200000e+01 : f32
    %279 = vector.broadcast %cst_136 : f32 to vector<1x1xf32>
    %280 = arith.divf %278, %279 : vector<1x1xf32>
    %281 = vector.broadcast %271 : vector<1x1xf32> to vector<1x32xf32>
    %282 = arith.subf %265, %281 : vector<1x32xf32>
    %cst_137 = arith.constant 9.99999974E-6 : f32
    %283 = vector.broadcast %cst_137 : f32 to vector<1x1xf32>
    %284 = arith.addf %280, %283 : vector<1x1xf32>
    %285 = math.rsqrt %284 : vector<1x1xf32>
    %286 = vector.broadcast %285 : vector<1x1xf32> to vector<1x32xf32>
    %287 = arith.mulf %282, %286 : vector<1x32xf32>
    %288 = arith.mulf %287, %266 : vector<1x32xf32>
    %289 = arith.addf %288, %267 : vector<1x32xf32>
    %c0_138 = arith.constant 0 : index
    %c0_139 = arith.constant 0 : index
    %290 = vector.load %arg20[%c0_138, %c0_139] : memref<32x32xf32, #tpu.memory_space<vmem>>, vector<32x32xf32>
    %cst_140 = arith.constant dense<0.000000e+00> : vector<1x32xf32>
    %291 = tpu.matmul %289, %290, %cst_140 {dimension_numbers = #tpu.dot_dimension_numbers<[1], [0], [0], [1], [0, 0, 1, 1], [], []>} : vector<1x32xf32>, vector<32x32xf32>, vector<1x32xf32> -> vector<1x32xf32>
    %c0_141 = arith.constant 0 : index
    %c0_142 = arith.constant 0 : index
    %292 = vector.load %arg21[%c0_141, %c0_142] : memref<1x32xf32, #tpu.memory_space<vmem>>, vector<1x32xf32>
    %293 = arith.addf %291, %292 : vector<1x32xf32>
    %cst_143 = arith.constant 5.000000e-01 : f32
    %294 = vector.broadcast %cst_143 : f32 to vector<1x32xf32>
    %295 = arith.mulf %294, %293 : vector<1x32xf32>
    %cst_144 = arith.constant 4.471500e-02 : f32
    %296 = vector.broadcast %cst_144 : f32 to vector<1x32xf32>
    %297 = arith.mulf %296, %293 : vector<1x32xf32>
    %298 = arith.mulf %297, %293 : vector<1x32xf32>
    %299 = arith.mulf %298, %293 : vector<1x32xf32>
    %300 = arith.addf %293, %299 : vector<1x32xf32>
    %cst_145 = arith.constant 0.797884583 : f32
    %301 = vector.broadcast %cst_145 : f32 to vector<1x32xf32>
    %302 = arith.mulf %301, %300 : vector<1x32xf32>
    %303 = math.tanh %302 : vector<1x32xf32>
    %cst_146 = arith.constant 1.000000e+00 : f32
    %304 = vector.broadcast %cst_146 : f32 to vector<1x32xf32>
    %305 = arith.addf %304, %303 : vector<1x32xf32>
    %306 = arith.mulf %295, %305 : vector<1x32xf32>
    %c0_147 = arith.constant 0 : index
    %c0_148 = arith.constant 0 : index
    %307 = vector.load %arg22[%c0_147, %c0_148] : memref<32x10xf32, #tpu.memory_space<vmem>>, vector<32x10xf32>
    %cst_149 = arith.constant dense<0.000000e+00> : vector<1x10xf32>
    %308 = tpu.matmul %306, %307, %cst_149 {dimension_numbers = #tpu.dot_dimension_numbers<[1], [0], [0], [1], [0, 0, 1, 1], [], []>} : vector<1x32xf32>, vector<32x10xf32>, vector<1x10xf32> -> vector<1x10xf32>
    %c0_150 = arith.constant 0 : index
    %c0_151 = arith.constant 0 : index
    %309 = vector.load %arg23[%c0_150, %c0_151] : memref<1x10xf32, #tpu.memory_space<vmem>>, vector<1x10xf32>
    %310 = arith.addf %308, %309 : vector<1x10xf32>
    %c0_152 = arith.constant 0 : index
    %c0_153 = arith.constant 0 : index
    %c0_154 = arith.constant 0 : index
    %311 = vector.load %arg24[%c0_152, %c0_153, %c0_154] : memref<1x1x10xf32, #tpu.memory_space<vmem>>, vector<1x1x10xf32>
    %312 = vector.shape_cast %311 : vector<1x1x10xf32> to vector<1x10xf32>
    %313 = vector.shape_cast %310 : vector<1x10xf32> to vector<1x1x10xf32>
    tpu.vector_store %arg24[%c0_152, %c0_153, %c0_154], %313 {strides = array<i32>} : memref<1x1x10xf32, #tpu.memory_space<vmem>>, vector<1x1x10xf32>,
    return
  }
  func.func @transform_0(%arg0: i32) -> (i32, i32, i32) {
    %c0_i32 = arith.constant 0 : i32
    %c0_i32_0 = arith.constant 0 : i32
    %c0_i32_1 = arith.constant 0 : i32
    return %arg0, %c0_i32, %c0_i32_0 : i32, i32, i32
  }
  func.func @transform_1(%arg0: i32) -> (i32, i32) {
    %c0_i32 = arith.constant 0 : i32
    %c0_i32_0 = arith.constant 0 : i32
    %c0_i32_1 = arith.constant 0 : i32
    return %c0_i32, %c0_i32_0 : i32, i32
  }
  func.func @transform_2(%arg0: i32) -> (i32, i32) {
    %c0_i32 = arith.constant 0 : i32
    %c0_i32_0 = arith.constant 0 : i32
    %c0_i32_1 = arith.constant 0 : i32
    return %c0_i32, %c0_i32_0 : i32, i32
  }
  func.func @transform_3(%arg0: i32) -> (i32, i32) {
    %c0_i32 = arith.constant 0 : i32
    %c0_i32_0 = arith.constant 0 : i32
    %c0_i32_1 = arith.constant 0 : i32
    return %c0_i32, %c0_i32_0 : i32, i32
  }
  func.func @transform_4(%arg0: i32) -> (i32, i32) {
    %c0_i32 = arith.constant 0 : i32
    %c0_i32_0 = arith.constant 0 : i32
    %c0_i32_1 = arith.constant 0 : i32
    return %c0_i32, %c0_i32_0 : i32, i32
  }
  func.func @transform_5(%arg0: i32) -> (i32, i32, i32) {
    %c0_i32 = arith.constant 0 : i32
    %c0_i32_0 = arith.constant 0 : i32
    %c0_i32_1 = arith.constant 0 : i32
    %c0_i32_2 = arith.constant 0 : i32
    return %c0_i32, %c0_i32_0, %c0_i32_1 : i32, i32, i32
  }
  func.func @transform_6(%arg0: i32) -> (i32, i32, i32) {
    %c0_i32 = arith.constant 0 : i32
    %c0_i32_0 = arith.constant 0 : i32
    %c0_i32_1 = arith.constant 0 : i32
    %c0_i32_2 = arith.constant 0 : i32
    return %c0_i32, %c0_i32_0, %c0_i32_1 : i32, i32, i32
  }
  func.func @transform_7(%arg0: i32) -> (i32, i32, i32) {
    %c0_i32 = arith.constant 0 : i32
    %c0_i32_0 = arith.constant 0 : i32
    %c0_i32_1 = arith.constant 0 : i32
    %c0_i32_2 = arith.constant 0 : i32
    return %c0_i32, %c0_i32_0, %c0_i32_1 : i32, i32, i32
  }
  func.func @transform_8(%arg0: i32) -> (i32, i32, i32) {
    %c0_i32 = arith.constant 0 : i32
    %c0_i32_0 = arith.constant 0 : i32
    %c0_i32_1 = arith.constant 0 : i32
    %c0_i32_2 = arith.constant 0 : i32
    return %c0_i32, %c0_i32_0, %c0_i32_1 : i32, i32, i32
  }
  func.func @transform_9(%arg0: i32) -> (i32, i32, i32) {
    %c0_i32 = arith.constant 0 : i32
    %c0_i32_0 = arith.constant 0 : i32
    %c0_i32_1 = arith.constant 0 : i32
    %c0_i32_2 = arith.constant 0 : i32
    return %c0_i32, %c0_i32_0, %c0_i32_1 : i32, i32, i32
  }
  func.func @transform_10(%arg0: i32) -> (i32, i32, i32) {
    %c0_i32 = arith.constant 0 : i32
    %c0_i32_0 = arith.constant 0 : i32
    %c0_i32_1 = arith.constant 0 : i32
    %c0_i32_2 = arith.constant 0 : i32
    return %c0_i32, %c0_i32_0, %c0_i32_1 : i32, i32, i32
  }
  func.func @transform_11(%arg0: i32) -> (i32, i32, i32) {
    %c0_i32 = arith.constant 0 : i32
    %c0_i32_0 = arith.constant 0 : i32
    %c0_i32_1 = arith.constant 0 : i32
    %c0_i32_2 = arith.constant 0 : i32
    return %c0_i32, %c0_i32_0, %c0_i32_1 : i32, i32, i32
  }
  func.func @transform_12(%arg0: i32) -> (i32, i32, i32) {
    %c0_i32 = arith.constant 0 : i32
    %c0_i32_0 = arith.constant 0 : i32
    %c0_i32_1 = arith.constant 0 : i32
    %c0_i32_2 = arith.constant 0 : i32
    return %c0_i32, %c0_i32_0, %c0_i32_1 : i32, i32, i32
  }
  func.func @transform_13(%arg0: i32) -> (i32, i32, i32) {
    %c0_i32 = arith.constant 0 : i32
    %c0_i32_0 = arith.constant 0 : i32
    %c0_i32_1 = arith.constant 0 : i32
    %c0_i32_2 = arith.constant 0 : i32
    return %c0_i32, %c0_i32_0, %c0_i32_1 : i32, i32, i32
  }
  func.func @transform_14(%arg0: i32) -> (i32, i32, i32) {
    %c0_i32 = arith.constant 0 : i32
    %c0_i32_0 = arith.constant 0 : i32
    %c0_i32_1 = arith.constant 0 : i32
    %c0_i32_2 = arith.constant 0 : i32
    return %c0_i32, %c0_i32_0, %c0_i32_1 : i32, i32, i32
  }
  func.func @transform_15(%arg0: i32) -> (i32, i32, i32) {
    %c0_i32 = arith.constant 0 : i32
    %c0_i32_0 = arith.constant 0 : i32
    %c0_i32_1 = arith.constant 0 : i32
    %c0_i32_2 = arith.constant 0 : i32
    return %c0_i32, %c0_i32_0, %c0_i32_1 : i32, i32, i32
  }
  func.func @transform_16(%arg0: i32) -> (i32, i32, i32) {
    %c0_i32 = arith.constant 0 : i32
    %c0_i32_0 = arith.constant 0 : i32
    %c0_i32_1 = arith.constant 0 : i32
    %c0_i32_2 = arith.constant 0 : i32
    return %c0_i32, %c0_i32_0, %c0_i32_1 : i32, i32, i32
  }
  func.func @transform_17(%arg0: i32) -> (i32, i32) {
    %c0_i32 = arith.constant 0 : i32
    %c0_i32_0 = arith.constant 0 : i32
    %c0_i32_1 = arith.constant 0 : i32
    return %c0_i32, %c0_i32_0 : i32, i32
  }
  func.func @transform_18(%arg0: i32) -> (i32, i32) {
    %c0_i32 = arith.constant 0 : i32
    %c0_i32_0 = arith.constant 0 : i32
    %c0_i32_1 = arith.constant 0 : i32
    return %c0_i32, %c0_i32_0 : i32, i32
  }
  func.func @transform_19(%arg0: i32) -> (i32, i32) {
    %c0_i32 = arith.constant 0 : i32
    %c0_i32_0 = arith.constant 0 : i32
    %c0_i32_1 = arith.constant 0 : i32
    return %c0_i32, %c0_i32_0 : i32, i32
  }
  func.func @transform_20(%arg0: i32) -> (i32, i32) {
    %c0_i32 = arith.constant 0 : i32
    %c0_i32_0 = arith.constant 0 : i32
    %c0_i32_1 = arith.constant 0 : i32
    return %c0_i32, %c0_i32_0 : i32, i32
  }
  func.func @transform_21(%arg0: i32) -> (i32, i32) {
    %c0_i32 = arith.constant 0 : i32
    %c0_i32_0 = arith.constant 0 : i32
    %c0_i32_1 = arith.constant 0 : i32
    return %c0_i32, %c0_i32_0 : i32, i32
  }
  func.func @transform_22(%arg0: i32) -> (i32, i32) {
    %c0_i32 = arith.constant 0 : i32
    %c0_i32_0 = arith.constant 0 : i32
    %c0_i32_1 = arith.constant 0 : i32
    return %c0_i32, %c0_i32_0 : i32, i32
  }
  func.func @transform_23(%arg0: i32) -> (i32, i32, i32) {
    %c0_i32 = arith.constant 0 : i32
    %c0_i32_0 = arith.constant 0 : i32
    %c0_i32_1 = arith.constant 0 : i32
    return %arg0, %c0_i32, %c0_i32_0 : i32, i32, i32
  }
}

</mosaic_0001>

<bundles_post_ra>
// kernel: forward.1
= control target key start
LH: loop header
LB: loop body
LE: loop exit
PB: predicated region body
PF: predicated region fallthrough
CT: control target
= control target key end

     0   :  { %s4335_s0 = inlined_call_operand.vmem [shape: f32[2,16,49], index: 0, kind: input, shape index: {}]   ;;  %s4336_s1 = inlined_call_operand.vmem [shape: f32[16,32], index: 1, kind: input, shape index: {}]   ;;  %s4337_s2 = inlined_call_operand.vmem [shape: f32[64,32], index: 2, kind: input, shape index: {}]   ;;  %s4338_s3 = inlined_call_operand.vmem [shape: f32[49,32], index: 3, kind: input, shape index: {}]   ;;  %s4339_s4 = inlined_call_operand.vmem [shape: f32[1,32], index: 4, kind: input, shape index: {}]   ;;  %s4340_s5 = inlined_call_operand.vmem [shape: f32[2,32,96], index: 5, kind: input, shape index: {}]   ;;  %s4341_s6 = inlined_call_operand.vmem [shape: f32[2,1,96], index: 6, kind: input, shape index: {}]   ;;  %s4342_s7 = inlined_call_operand.vmem [shape: f32[2,32,32], index: 7, kind: input, shape index: {}]   ;;  %s4343_s8 = inlined_call_operand.vmem [shape: f32[2,1,32], index: 8, kind: input, shape index: {}]   ;;  %s4344_s9 = inlined_call_operand.vmem [shape: f32[2,32,64], index: 9, kind: input, shape index: {}]   ;;  %s4345_s10 = inlined_call_operand.vmem [shape: f32[2,1,64], index: 10, kind: input, shape index: {}]   ;;  %s4346_s11 = inlined_call_operand.vmem [shape: f32[2,64,32], index: 11, kind: input, shape index: {}]   ;;  %s4347_s12 = inlined_call_operand.vmem [shape: f32[2,1,32], index: 12, kind: input, shape index: {}]   ;;  %s4348_s13 = inlined_call_operand.vmem [shape: f32[2,1,32], index: 13, kind: input, shape index: {}]   ;;  %s4349_s14 = inlined_call_operand.vmem [shape: f32[2,1,32], index: 14, kind: input, shape index: {}]   ;;  %s4350_s15 = inlined_call_operand.vmem [shape: f32[2,1,32], index: 15, kind: input, shape index: {}]   ;;  %s4351_s16 = inlined_call_operand.vmem [shape: f32[2,1,32], index: 16, kind: input, shape index: {}]   ;;  %s4352_s17 = inlined_call_operand.vmem [shape: f32[1,32], index: 17, kind: input, shape index: {}]   ;;  %s4353_s18 = inlined_call_operand.vmem [shape: f32[1,32], index: 18, kind: input, shape index: {}]   ;;  %s4354_s19 = inlined_call_operand.vmem [shape: f32[32,32], index: 19, kind: input, shape index: {}]   ;;  %s4355_s20 = inlined_call_operand.vmem [shape: f32[1,32], index: 20, kind: input, shape index: {}]   ;;  %s4356_s21 = inlined_call_operand.vmem [shape: f32[32,10], index: 21, kind: input, shape index: {}]   ;;  %s4357_s22 = inlined_call_operand.vmem [shape: f32[1,10], index: 22, kind: input, shape index: {}]   ;;  %s4358_s23 = inlined_call_operand.hbm [shape: f32[2,1,10], index: 23, kind: output, shape index: {}]  }
   0x1   :  { %4378 = sst [smem:[#allocation11_spill]] %s4335_s0 }
   0x2   :  { %4379 = sst [smem:[#allocation12_spill]] %s4336_s1 }
   0x3   :  { %4380 = sst [smem:[#allocation13_spill]] %s4337_s2 }
   0x4   :  { %4381 = sst [smem:[#allocation14_spill]] %s4338_s3 }
   0x5   :  { %4382 = sst [smem:[#allocation15_spill]] %s4339_s4 }
   0x6   :  { %4383 = sst [smem:[#allocation16_spill]] %s4340_s5 }
   0x7   :  { %4384 = sst [smem:[#allocation17_spill]] %s4341_s6 }
   0x8   :  { %4385 = sst [smem:[#allocation18_spill]] %s4342_s7 }
   0x9   :  { %4386 = sst [smem:[#allocation19_spill]] %s4357_s22 }
   0xa   :  { %4387 = sst [smem:[#allocation20_spill]] %s4358_s23 }
   0xb   :  { %28 = vsyncpa [#allocation3], 0 }
   0xc   :  { %30 = vsyncpa [#allocation3 + $0x1], 0  ;;  %s3761_s4 = smov 0   ;;  %s3763_s30 = smov 0  }
   0xd   :  { %s3765_s24 = smov 0   ;;  %s3767_s25 = smov 0  }
   0xe LB: > { %4388 = sst [smem:[#allocation5_spill]] %s3621_s4  ;;  %s3782_s5 = sadd.s32 4294967295, %s3633_s25   ;;  %s3633_s25 = sphi %s3767_s25, %s4413_s25   ;;  %s3629_s24 = sphi %s3765_s24, %s4418_s24   ;;  %s3625_s30 = sphi %s3763_s30, %s4417_s30   ;;  %s3621_s4 = sphi %s3761_s4, %s4416_s4  }
   0xf   : > { %4389 = sst [smem:[#allocation6_spill]] %s3629_s24  ;;  %s2849_s1 = sadd.s32 4294967294, %s3633_s25  }
  0x10   : > { %4390 = sst [smem:[#allocation7_spill]] %s3633_s25  ;;  %s3786_s26 = sadd.s32 1, %s3633_s25  }
  0x11   : > { %4391 = sst [smem:[#allocation8_spill]] %s3786_s26  ;;  %s531_s2 = sadd.s32 1, %s3629_s24 }
  0x12   : > { %s528_s6 = ssub.s32 %s3633_s25, %s3786_s26  ;;  %p541_p0 = scmp.ne.s32.totalorder %s3629_s24, %s3625_s30 }
  0x13   : > { %p529_p1 = scmp.eq.s32.totalorder %s528_s6, 0  ;;  %p542_p2 = scmp.eq.s32.totalorder %s3782_s5, 1 }
  0x14   : > { %p547_p3 = scmp.ne.s32.totalorder %s3625_s30, %s3621_s4  ;;  %p548_p4 = scmp.eq.s32.totalorder %s2849_s1, 1 }
  0x15   : > { %s3797_s27 = scalar_select %p529_p1, %s3629_s24, %s531_s2  }
  0x16   : > { %p3799_p5 = por %p542_p2, %p541_p0  ;;  %p3803_p6 = por %p548_p4, %p547_p3 }
  0x17   : > { %4392 = sst [smem:[#allocation9_spill]] %s3797_s27  ;;  %p2852_p7 = scmp.ge.s32.totalorder %s3633_s25, 1 }
  0x18   : > { %s4394_s28 = scalar_select %p3803_p6, 1, 0 }
  0x19   : > { %p640_p8 = scmp.lt.s32.totalorder %s3633_s25, 3 }
  0x1a   : > { %4395 = sst [smem:[#allocation10_spill]] %s4394_s28 }
  0x1b   : > { %p641_p9 = pnand %p2852_p7, %p640_p8 }
  0x1c   : > { %s4396_s0 = sld [smem:[#allocation14_spill]] (!%p641_p9)  ;;  %p703_p10 = scmp.lt.s32.totalorder (!%p641_p9), %s3782_s5, 1  ;;  %vm724_vm0 = vcmask (!%p641_p9), 400384   ;;  %vm731_vm1 = vcmask (!%p641_p9), 1040384   ;;  %vm833_vm2 = vcmask (!%p641_p9), 261120   ;;  %vm1070_vm4 = vcmask (!%p641_p9), 130048  }
  0x1d   : > { %644 = sbr.rel (%p641_p9) target bundleno = 5926 (0x1726), region = 112  ;;  %s4397_s27 = sld [smem:[#allocation16_spill]] (!%p641_p9)  ;;  %vm3882_vm3 = vmpackc.low (!%p641_p9), %vm833_vm2, %vm833_vm2  ;;  %vm1572_vm5 = vcmask (!%p641_p9), 523264   ;;  %vm3638_vm6 = vmmov (!%p641_p9), 0   ;;  %vm2779_vm7 = vcmask (!%p641_p9), 73728  }
  0x1e   : > { %s4398_s28 = sld [smem:[#allocation11_spill]] (!%p641_p9)  ;;  %s4399_s26 = sld [smem:[#allocation15_spill]] (!%p641_p9) }
  0x1f   : > { %s4400_s23 = sld [smem:[#allocation12_spill]] (!%p641_p9)  ;;  %s4401_s6 = sld [smem:[#allocation17_spill]] (!%p641_p9) }
  0x20   : > { %s4407_s25 = smov (!%p641_p9), 64   ;;  %s4409_s2 = sld [smem:[#allocation20_spill]] (!%p641_p9) }
  0x22   : > { %v710_v0 = vld [vmem:[%s4396_s0] sm:$0xff] (!%p641_p9)  ;;  %v711_v1 = vld [vmem:[%s4396_s0 + $0x8] sm:$0xff] (!%p641_p9)  ;;  %v712_v2 = vld [vmem:[%s4396_s0 + $0x10] sm:$0xff] (!%p641_p9) }
  0x23   : > { %v3283_v3 = vpack.c.bf16 (!%p641_p9), %v711_v1, %v710_v0  ;;  %v713_v4 = vld [vmem:[%s4396_s0 + $0x18] sm:$0xff] (!%p641_p9)  ;;  %v714_v5 = vld [vmem:[%s4396_s0 + $0x20] sm:$0xff] (!%p641_p9)  ;;  %v715_v7 = vld [vmem:[%s4396_s0 + $0x28] sm:$0xff] (!%p641_p9) }
  0x24   : > { %v3287_v6 = vpack.c.bf16 %v713_v4, %v712_v2  ;;  %s704_s1 = scalar_select %p703_p10, %s3782_s5, 1  ;;  %v822_v8 = vld [vmem:[%s4397_s27] sm:$0xff]  ;;  %v823_v9 = vld [vmem:[%s4397_s27 + $0x8] sm:$0xff]  ;;  %v3291_v11 = vpack.c.bf16 %v715_v7, %v714_v5  ;;  %v716_v13 = vld [vmem:[%s4396_s0 + $0x30] sm:$0x1] }
  0x25   : > { %3284 = vmatprep.subr.bf16.mxu0 %v3283_v3  ;;  %v3295_v10 = vpack.c.bf16 %v823_v9, %v822_v8  ;;  %v824_v15 = vld [vmem:[%s4397_s27 + $0x10] sm:$0xff]  ;;  %v825_v16 = vld [vmem:[%s4397_s27 + $0x18] sm:$0xff]  ;;  %v2855_v18 = vld [vmem:[%s4399_s26] ss:$0 sm:$0xff]  ;;  %s4402_s26 = sld [smem:[#allocation13_spill]] }
  0x26   : > { %3286 = vmatpush3.bf16.msra.mxu0 %v3283_v3  ;;  %s2960_s24 = sshll.u32 %s704_s1, 4  ;;  %v3299_v17 = vpack.c.bf16 %v825_v16, %v824_v15  ;;  %v810_v22 = vld [vmem:[%s4400_s23] sm:$0xff]  ;;  %v811_v23 = vld [vmem:[%s4400_s23 + $0x8] sm:$0xff]  ;;  %s4405_s1 = sld [smem:[#allocation18_spill]] }
  0x27   : > { %3288 = vmatprep.subr.bf16.mxu0 %v3287_v6  ;;  %s707_s29 = scalar_lea.vmem %s4398_s28, %s2960_s24  ;;  %3296 = vmatprep.subr.bf16.mxu1 %v3295_v10  ;;  %v2859_v27 = vld [vmem:[%s4401_s6] ss:$0 sm:$0xff]  ;;  %s4373_s28 = smov 96  }
  0x28   : > { %v708_v12 = vld [vmem:[%s707_s29] sm:$0xff]  ;;  %3298 = vmatpush3.bf16.msra.mxu1 %v3295_v10  ;;  %v709_v14 = vld [vmem:[%s707_s29 + $0x8] sm:$0xff]  ;;  %s4372_s29 = smov 64   ;;  %s701_s24 = sand.u32 1, %s3625_s30  }
  0x29   : > { %3090 = vmatprep.mubr.msk.f32.mxu0 %vm724_vm0, %v708_v12  ;;  %3300 = vmatprep.subr.bf16.mxu1 %v3299_v17  ;;  %s2782_s4 = scalar_lea.sflag [#allocation3], %s701_s24 }
  0x2a   : > { %3290 = vmatpush3.bf16.msra.mxu0 %v3287_v6 }
  0x2b   : > { %3292 = vmatprep.subr.bf16.mxu0 %v3291_v11  ;;  %v3872_v31 = vld [vmem:[%s4402_s26] sm:$0xff]  ;;  %v3893_v40 = vld [vmem:[%s4402_s26 + $0x8] sm:$0xff]  ;;  %v3898_v41 = vld [vmem:[%s4402_s26 + $0x10] sm:$0xff] }
  0x2c   : > { %3302 = vmatpush3.bf16.msra.mxu1 %v3299_v17  ;;  %v3905_v44 = vld [vmem:[%s4402_s26 + $0x18] sm:$0xff]  ;;  %v3911_v45 = vld [vmem:[%s4402_s26 + $0x20] sm:$0xff]  ;;  %v3919_v48 = vld [vmem:[%s4402_s26 + $0x28] sm:$0xff] }
  0x2d   : > { %v3925_v49 = vld [vmem:[%s4402_s26 + $0x30] sm:$0xff]  ;;  %v3933_v52 = vld [vmem:[%s4402_s26 + $0x38] sm:$0xff] }
  0x2e   : > { %3294 = vmatpush3.bf16.msra.mxu0 %v3291_v11 }
  0x2f   : > { %3088 = vmatprep.subr.msk.mxu0 %vm731_vm1, %v716_v13 }
  0x32   : > { %3089 = vmatpush3.msk.msra.mxu0 %vm731_vm1, %v716_v13 }
  0x33   : > { %3091 = vmatmul.mubr.msk.f32.vlgmr.msra.gmra.mrb[0].mxu0 %vm724_vm0, %v709_v14 }
 0x106   : > { %v3092_v19 = vpop.f32.mrb[0].mxu0 }
 0x107   : > { %v807_v20 = vadd.f32 %v3092_v19, %v2855_v18  ;;  %v801_v21 = vpop.f32.mrb[1].mxu0 }
 0x108   : > { %v802_v24 = vadd.f32 %v2855_v18, %v801_v21 }
 0x109   : > { %v3860_v26 = vadd.f32 %v811_v23, %v807_v20 }
 0x10a   : > { %v3858_v25 = vadd.f32 %v810_v22, %v802_v24 }
 0x10c   : > { %3101 = vmatprep.mubr.msk.f32.mxu1 %vm833_vm2, %v3858_v25 }
 0x10d   : > { %3102 = vmatmul.mubr.msk.f32.vlgmr.msra.gmra.mrb[0].mxu1 %vm833_vm2, %v3860_v26 }
 0x1e0   : > { %v3103_v28 = vpop.f32.mrb[0].mxu1 }
 0x1e1   : > { %v912_v29 = vadd.f32 %v3103_v28, %v2859_v27  ;;  %v906_v30 = vpop.f32.mrb[1].mxu1 }
 0x1e2   : > { %v907_v32 = vadd.f32 %v2859_v27, %v906_v30 }
 0x1e3   : > { %v916_v42 = vmul.f32 %v912_v29, %v3893_v40  ;;  %v918_v46 = vmul.f32 %v912_v29, %v3905_v44  ;;  %v920_v50 = vmul.f32 %v912_v29, %v3919_v48  ;;  %v922_v53 = vmul.f32 %v912_v29, %v3933_v52 }
 0x1e4   : > { %v3874_v33 = vpack.i.bf16 %v912_v29, %v907_v32  ;;  %v915_v34 = vmul.f32 %v907_v32, %v3872_v31  ;;  %v917_v43 = vmul.f32 %v907_v32, %v3898_v41  ;;  %v919_v47 = vmul.f32 %v907_v32, %v3911_v45 }
 0x1e5   : > { %v921_v51 = vmul.f32 %v907_v32, %v3925_v49 }
 0x1e6   : > { %3452 = vrot.lane.b32.xlu0 %v3874_v33, %s4373_s28  ;;  %3108 = vmatprep.mubr.msk.f32.mxu1 %vm833_vm2, %v915_v34  ;;  %s4408_s28 = sld [smem:[#allocation19_spill]] }
 0x258   : > { %v3453_v35 = vpop.permute.xlu0 %3452 }
 0x259   : > { %v3455_v36 = vunpack.i.h.bf16 %v3453_v35  ;;  %v3454_v37 = vunpack.i.l.bf16 %v3453_v35 }
 0x25b   : > { %v3303_v39 = vpack.c.bf16 %v3455_v36, %v3454_v37 }
 0x25d   : > { %3305 = vmatprep.subr.msk.bf16.mxu1 %vm3882_vm3, %v3303_v39 }
 0x25e   : > { %3308 = vmatpush3.bf16.xpose.msk.msra.mxu1 %vm3882_vm3, %v3303_v39 }
 0x265   : > { %3109 = vmatmul.mubr.msk.f32.vlgmr.msra.gmra.mrb[2].mxu1 %vm833_vm2, %v916_v42 }
 0x266   : > { %3111 = vmatprep.mubr.msk.f32.mxu1 %vm833_vm2, %v917_v43 }
 0x269   : > { %3112 = vmatmul.mubr.msk.f32.gmra.mrb[4].mxu1 %vm833_vm2, %v918_v46 }
 0x26a   : > { %3114 = vmatprep.mubr.msk.f32.mxu1 %vm833_vm2, %v919_v47 }
 0x26d   : > { %3115 = vmatmul.mubr.msk.f32.gmra.mrb[6].mxu1 %vm833_vm2, %v920_v50 }
 0x26e   : > { %3117 = vmatprep.mubr.msk.f32.mxu1 %vm833_vm2, %v921_v51 }
 0x271   : > { %3118 = vmatmul.mubr.msk.f32.gmra.mrb[8].mxu1 %vm833_vm2, %v922_v53 }
 0x338   : > { %v3110_v54 = vpop.f32.mrb[2].mxu1 }
 0x339   : > { %v1063_v55 = vmul.f32 0.35355338, %v3110_v54  ;;  %v1023_v56 = vpop.f32.mrb[3].mxu1 }
 0x33a   : > { %v1062_v57 = vmul.f32 0.35355338, %v1023_v56 }
 0x33b   : > { %v1074_v58 = vsel %vm1070_vm4, %v1063_v55, -inf }
 0x33c   : > { %1075 = vmax.xlane.f32.xlu1 %v1074_v58  ;;  %v3113_v59 = vpop.f32.mrb[4].mxu1  ;;  %v1071_v60 = vsel %vm1070_vm4, %v1062_v57, -inf }
 0x33d   : > { %v1065_v61 = vmul.f32 0.35355338, %v3113_v59  ;;  %1072 = vmax.xlane.f32.xlu0 %v1071_v60  ;;  %v1033_v62 = vpop.f32.mrb[5].mxu1 }
 0x33e   : > { %v1064_v63 = vmul.f32 0.35355338, %v1033_v62 }
 0x33f   : > { %v1080_v0 = vsel %vm1070_vm4, %v1065_v61, -inf }
 0x340   : > { %1081 = vmax.xlane.f32.xlu1 %v1080_v0  ;;  %v3116_v1 = vpop.f32.mrb[6].mxu1  ;;  %v1077_v4 = vsel %vm1070_vm4, %v1064_v63, -inf }
 0x341   : > { %v1043_v2 = vpop.f32.mrb[7].mxu1  ;;  %v1067_v3 = vmul.f32 0.35355338, %v3116_v1 }
 0x342   : > { %v1066_v7 = vmul.f32 0.35355338, %v1043_v2 }
 0x343   : > { %v1086_v8 = vsel %vm1070_vm4, %v1067_v3, -inf }
 0x344   : > { %1078 = vmax.xlane.f32.xlu1 %v1077_v4  ;;  %v3119_v5 = vpop.f32.mrb[8].mxu1  ;;  %v1083_v10 = vsel %vm1070_vm4, %v1066_v7, -inf }
 0x345   : > { %v1053_v6 = vpop.f32.mrb[9].mxu1  ;;  %v1069_v11 = vmul.f32 0.35355338, %v3119_v5 }
 0x346   : > { %v1068_v9 = vmul.f32 0.35355338, %v1053_v6 }
 0x347   : > { %v1092_v13 = vsel %vm1070_vm4, %v1069_v11, -inf }
 0x348   : > { %1087 = vmax.xlane.f32.xlu1 %v1086_v8  ;;  %v1089_v12 = vsel %vm1070_vm4, %v1068_v9, -inf }
 0x34c   : > { %1084 = vmax.xlane.f32.xlu1 %v1083_v10 }
 0x350   : > { %1090 = vmax.xlane.f32.xlu1 %v1089_v12 }
 0x354   : > { %1093 = vmax.xlane.f32.xlu1 %v1092_v13 }
 0x3c9   : > { %v1076_v14 = vpop.xlane.xlu1 %1075 }
 0x3ca   : > { %v1096_v15 = vsub.f32 %v1063_v55, %v1076_v14  ;;  %v1073_v16 = vpop.xlane.xlu0 %1072 }
 0x3cb   : > { %v1095_v17 = vsub.f32 %v1062_v57, %v1073_v16 }
 0x3cc   : > { %v1105_v18 = vmul.f32 1.442695, %v1096_v15 }
 0x3cd   : > { %v1103_v19 = vmul.f32 1.442695, %v1095_v17  ;;  %v1082_v20 = vpop.xlane.xlu1 %1081 }
 0x3ce   : > { %v1098_v21 = vsub.f32 %v1065_v61, %v1082_v20 }
 0x3cf   : > { %3471 = vpow2.f32 %v1103_v19 }
 0x3d0   : > { %3473 = vpow2.f32 %v1105_v18  ;;  %v1109_v22 = vmul.f32 1.442695, %v1098_v21 }
 0x3d1   : > { %v1079_v23 = vpop.xlane.xlu1 %1078 }
 0x3d2   : > { %v1097_v24 = vsub.f32 %v1064_v63, %v1079_v23  ;;  %3475 = vpow2.f32 %v1109_v22 }
 0x3d4   : > { %v1107_v27 = vmul.f32 1.442695, %v1097_v24 }
 0x3d5   : > { %v1088_v28 = vpop.xlane.xlu1 %1087 }
 0x3d6   : > { %3477 = vpow2.f32 %v1107_v27  ;;  %v1100_v29 = vsub.f32 %v1067_v3, %v1088_v28 }
 0x3d8   : > { %v1113_v30 = vmul.f32 1.442695, %v1100_v29 }
 0x3d9   : > { %v3472_v32 = vpop.eup %3471  ;;  %v1085_v34 = vpop.xlane.xlu1 %1084 }
 0x3da   : > { %3479 = vpow2.f32 %v1113_v30  ;;  %v1099_v35 = vsub.f32 %v1066_v7, %v1085_v34  ;;  %v1119_v36 = vsel %vm1070_vm4, %v3472_v32, 0.0  ;;  %v3474_v37 = vpop.eup %3473  ;;  %v1309_v34 = vld [vmem:[%s4405_s1 + $0x8] sm:$0xff] }
 0x3db   : > { %1120 = vadd.xlane.f32.xlu1 %v1119_v36  ;;  %v1122_v46 = vsel %vm1070_vm4, %v3474_v37, 0.0  ;;  %v1310_v36 = vld [vmem:[%s4405_s1 + $0x10] sm:$0xff] }
 0x3dc   : > { %v1111_v39 = vmul.f32 1.442695, %v1099_v35  ;;  %v3476_v47 = vpop.eup %3475 }
 0x3dd   : > { %v1091_v42 = vpop.xlane.xlu1 %1090  ;;  %v1128_v56 = vsel %vm1070_vm4, %v3476_v47, 0.0 }
 0x3de   : > { %3481 = vpow2.f32 %v1111_v39  ;;  %v1101_v43 = vsub.f32 %v1068_v9, %v1091_v42 }
 0x3df   : > { %1123 = vadd.xlane.f32.xlu1 %v1122_v46 }
 0x3e0   : > { %v3478_v50 = vpop.eup %3477  ;;  %v1115_v51 = vmul.f32 1.442695, %v1101_v43 }
 0x3e1   : > { %v1094_v53 = vpop.xlane.xlu1 %1093  ;;  %v1125_v54 = vsel %vm1070_vm4, %v3478_v50, 0.0 }
 0x3e2   : > { %3483 = vpow2.f32 %v1115_v51  ;;  %v1102_v55 = vsub.f32 %v1069_v11, %v1094_v53  ;;  %1126 = vadd.xlane.f32.xlu0 %v1125_v54 }
 0x3e3   : > { %1129 = vadd.xlane.f32.xlu1 %v1128_v56 }
 0x3e4   : > { %v3480_v57 = vpop.eup %3479  ;;  %v1117_v58 = vmul.f32 1.442695, %v1102_v55 }
 0x3e5   : > { %v1134_v59 = vsel %vm1070_vm4, %v3480_v57, 0.0 }
 0x3e6   : > { %3485 = vpow2.f32 %v1117_v58 }
 0x3e7   : > { %1135 = vadd.xlane.f32.xlu1 %v1134_v59 }
 0x3e8   : > { %v3482_v60 = vpop.eup %3481 }
 0x3e9   : > { %v1131_v61 = vsel %vm1070_vm4, %v3482_v60, 0.0 }
 0x3ea   : > { %1132 = vadd.xlane.f32.xlu0 %v1131_v61 }
 0x3ec   : > { %v3484_v62 = vpop.eup %3483 }
 0x3ed   : > { %v1137_v63 = vsel %vm1070_vm4, %v3484_v62, 0.0 }
 0x3ee   : > { %1138 = vadd.xlane.f32.xlu0 %v1137_v63 }
 0x3f0   : > { %v3486_v0 = vpop.eup %3485 }
 0x3f1   : > { %v1140_v1 = vsel %vm1070_vm4, %v3486_v0, 0.0 }
 0x3f2   : > { %1141 = vadd.xlane.f32.xlu1 %v1140_v1 }
 0x404   : > { %3457 = vrot.lane.b32.xlu0 %v3874_v33, %s4372_s29  ;;  %s4406_s29 = smov 96  }
 0x468   : > { %v1121_v2 = vpop.xlane.xlu1 %1120 }
 0x469   : > { %3487 = vrcp.f32 %v1121_v2 }
 0x46c   : > { %v1124_v3 = vpop.xlane.xlu1 %1123 }
 0x46d   : > { %3489 = vrcp.f32 %v1124_v3 }
 0x46f   : > { %v1127_v5 = vpop.xlane.xlu0 %1126 }
 0x470   : > { %v1130_v8 = vpop.xlane.xlu1 %1129  ;;  %3491 = vrcp.f32 %v1127_v5  ;;  %v2880_v5 = vld [vmem:[%s4343_s8] ss:$0 sm:$0xff] }
 0x471   : > { %3493 = vrcp.f32 %v1130_v8 }
 0x473   : > { %v3488_v4 = vpop.eup %3487 }
 0x474   : > { %v1151_v6 = vmul.f32 %v3488_v4, %v3472_v32  ;;  %v1136_v10 = vpop.xlane.xlu1 %1135  ;;  %v1308_v32 = vld [vmem:[%s4405_s1] sm:$0xff] }
 0x475   : > { %v3313_v35 = vpack.c.bf16 %v1309_v34, %v1308_v32 }
 0x476   : > { %3124 = vmatprep.mubr.msk.f32.mxu0 %vm1070_vm4, %v1151_v6 }
 0x477   : > { %v1133_v7 = vpop.xlane.xlu0 %1132  ;;  %v3490_v15 = vpop.eup %3489  ;;  %3314 = vmatprep.subr.bf16.mxu1 %v3313_v35 }
 0x478   : > { %3495 = vrcp.f32 %v1133_v7  ;;  %v1152_v17 = vmul.f32 %v3490_v15, %v3474_v37  ;;  %3316 = vmatpush3.bf16.msra.mxu1 %v3313_v35  ;;  %v1311_v37 = vld [vmem:[%s4405_s1 + $0x18] sm:$0xff] }
 0x479   : > { %3497 = vrcp.f32 %v1136_v10  ;;  %v3317_v39 = vpack.c.bf16 %v1311_v37, %v1310_v36 }
 0x47a   : > { %v3492_v16 = vpop.eup %3491 }
 0x47b   : > { %v1139_v9 = vpop.xlane.xlu0 %1138  ;;  %v3494_v18 = vpop.eup %3493  ;;  %v1153_v19 = vmul.f32 %v3492_v16, %v3478_v50  ;;  %3318 = vmatprep.subr.bf16.mxu1 %v3317_v39 }
 0x47c   : > { %3499 = vrcp.f32 %v1139_v9  ;;  %v1154_v21 = vmul.f32 %v3494_v18, %v3476_v47  ;;  %3320 = vmatpush3.bf16.msra.mxu1 %v3317_v39  ;;  %v2883_v39 = vld [vmem:[%s4348_s13] ss:$0 sm:$0xff] }
 0x47f   : > { %v3458_v11 = vpop.permute.xlu0 %3457  ;;  %v1142_v14 = vpop.xlane.xlu1 %1141 }
 0x480   : > { %v3460_v12 = vunpack.i.h.bf16 %v3458_v11  ;;  %v3459_v13 = vunpack.i.l.bf16 %v3458_v11  ;;  %3501 = vrcp.f32 %v1142_v14 }
 0x482   : > { %v3309_v33 = vpack.c.bf16 %v3460_v12, %v3459_v13  ;;  %v3496_v20 = vpop.eup %3495 }
 0x483   : > { %v3498_v22 = vpop.eup %3497  ;;  %v1155_v23 = vmul.f32 %v3496_v20, %v3482_v60 }
 0x484   : > { %3310 = vmatprep.subr.bf16.mxu0 %v3309_v33  ;;  %v1156_v27 = vmul.f32 %v3498_v22, %v3480_v57  ;;  %v1448_v22 = vld [vmem:[%s4344_s9 + $0x8] sm:$0xff] }
 0x485   : > { %3312 = vmatpush3.bf16.msra.mxu0 %v3309_v33 }
 0x486   : > { %v3500_v24 = vpop.eup %3499 }
 0x487   : > { %v1157_v29 = vmul.f32 %v3500_v24, %v3484_v62  ;;  %v1449_v24 = vld [vmem:[%s4344_s9 + $0x10] sm:$0xff] }
 0x488   : > { %3125 = vmatmul.mubr.msk.f32.vlgmr.msra.gmra.mrb[2].mxu0 %vm1070_vm4, %v1152_v17 }
 0x489   : > { %3127 = vmatprep.mubr.msk.f32.mxu0 %vm1070_vm4, %v1153_v19 }
 0x48a   : > { %v3502_v28 = vpop.eup %3501 }
 0x48b   : > { %v1158_v30 = vmul.f32 %v3502_v28, %v3486_v0 }
 0x48c   : > { %3128 = vmatmul.mubr.msk.f32.gmra.mrb[4].mxu0 %vm1070_vm4, %v1154_v21 }
 0x48d   : > { %3130 = vmatprep.mubr.msk.f32.mxu0 %vm1070_vm4, %v1155_v23 }
 0x490   : > { %3131 = vmatmul.mubr.msk.f32.gmra.mrb[6].mxu0 %vm1070_vm4, %v1156_v27  ;;  %v1450_v27 = vld [vmem:[%s4344_s9 + $0x18] sm:$0xff] }
 0x491   : > { %3133 = vmatprep.mubr.msk.f32.mxu0 %vm1070_vm4, %v1157_v29  ;;  %v3325_v28 = vpack.c.bf16 %v1450_v27, %v1449_v24 }
 0x494   : > { %3134 = vmatmul.mubr.msk.f32.gmra.mrb[8].mxu0 %vm1070_vm4, %v1158_v30 }
 0x55b   : > { %v3126_v42 = vpop.f32.mrb[2].mxu0 }
 0x55c   : > { %v1255_v43 = vpop.f32.mrb[3].mxu0  ;;  %v1295_v47 = vmul.f32 %v3126_v42, %v3893_v40 }
 0x55d   : > { %v1294_v53 = vmul.f32 %v1255_v43, %v3872_v31  ;;  %v2884_v43 = vld [vmem:[%s4349_s14] ss:$0 sm:$0xff] }
 0x55f   : > { %v3129_v46 = vpop.f32.mrb[4].mxu0 }
 0x560   : > { %v1297_v50 = vmul.f32 %v3129_v46, %v3905_v44  ;;  %v1265_v51 = vpop.f32.mrb[5].mxu0 }
 0x561   : > { %v1296_v54 = vmul.f32 %v1265_v51, %v3898_v41 }
 0x562   : > { %v1303_v55 = vadd.f32 %v1297_v50, %v1295_v47 }
 0x563   : > { %v1302_v56 = vadd.f32 %v1296_v54, %v1294_v53  ;;  %v3132_v57 = vpop.f32.mrb[6].mxu0 }
 0x564   : > { %v1299_v58 = vmul.f32 %v3132_v57, %v3919_v48  ;;  %v1275_v59 = vpop.f32.mrb[7].mxu0 }
 0x565   : > { %v1298_v60 = vmul.f32 %v1275_v59, %v3911_v45  ;;  %v1560_v59 = vld [vmem:[%s4346_s11 + $0x18] sm:$0xff] }
 0x566   : > { %v1305_v61 = vadd.f32 %v1303_v55, %v1299_v58  ;;  %v1557_v55 = vld [vmem:[%s4346_s11] sm:$0xff]  ;;  %v1559_v58 = vld [vmem:[%s4346_s11 + $0x10] sm:$0xff] }
 0x567   : > { %v1304_v62 = vadd.f32 %v1302_v56, %v1298_v60  ;;  %v3135_v63 = vpop.f32.mrb[8].mxu0  ;;  %v1558_v56 = vld [vmem:[%s4346_s11 + $0x8] sm:$0xff]  ;;  %v3333_v60 = vpack.c.bf16 %v1560_v59, %v1559_v58  ;;  %v2896_v58 = vld [vmem:[%s4397_s27 + $0x38] sm:$0xff] }
 0x568   : > { %v1301_v0 = vmul.f32 %v3135_v63, %v3933_v52  ;;  %v1285_v1 = vpop.f32.mrb[9].mxu0  ;;  %v3329_v57 = vpack.c.bf16 %v1558_v56, %v1557_v55  ;;  %v2894_v55 = vld [vmem:[%s4397_s27 + $0x28] sm:$0xff] }
 0x569   : > { %v1300_v2 = vmul.f32 %v1285_v1, %v3925_v49  ;;  %v1564_v1 = vld [vmem:[%s4346_s11 + $0x38] sm:$0xff] }
 0x56a   : > { %v1307_v3 = vadd.f32 %v1305_v61, %v1301_v0  ;;  %v1561_v61 = vld [vmem:[%s4346_s11 + $0x20] sm:$0xff]  ;;  %3330 = vmatprep.subr.bf16.mxu1 %v3329_v57  ;;  %v1563_v0 = vld [vmem:[%s4346_s11 + $0x30] sm:$0xff] }
 0x56b   : > { %v1306_v4 = vadd.f32 %v1304_v62, %v1300_v2  ;;  %v1562_v62 = vld [vmem:[%s4346_s11 + $0x28] sm:$0xff]  ;;  %v3341_v2 = vpack.c.bf16 %v1564_v1, %v1563_v0 }
 0x56c   : > { %v3337_v63 = vpack.c.bf16 %v1562_v62, %v1561_v61 }
 0x56d   : > { %3144 = vmatprep.mubr.msk.f32.mxu1 %vm833_vm2, %v1306_v4 }
 0x56e   : > { %3145 = vmatmul.mubr.msk.f32.vlgmr.msra.gmra.mrb[10].mxu1 %vm833_vm2, %v1307_v3  ;;  %v2885_v3 = vld [vmem:[%s4345_s10] ss:$0 sm:$0xff] }
 0x56f   : > { %3332 = vmatpush3.bf16.msra.mxu1 %v3329_v57  ;;  %v2895_v57 = vld [vmem:[%s4397_s27 + $0x30] sm:$0xff] }
 0x570   : > { %3334 = vmatprep.subr.bf16.mxu1 %v3333_v60  ;;  %v3349_v59 = vpack.c.bf16 %v2896_v58, %v2895_v57 }
 0x573   : > { %3336 = vmatpush3.bf16.msra.mxu1 %v3333_v60 }
 0x574   : > { %3338 = vmatprep.subr.bf16.mxu1 %v3337_v63 }
 0x577   : > { %3340 = vmatpush3.bf16.msra.mxu1 %v3337_v63 }
 0x578   : > { %3342 = vmatprep.subr.bf16.mxu1 %v3341_v2 }
 0x57b   : > { %3344 = vmatpush3.bf16.msra.mxu1 %v3341_v2 }
 0x641   : > { %v3146_v6 = vpop.f32.mrb[10].mxu1 }
 0x642   : > { %v1391_v7 = vpop.f32.mrb[11].mxu1  ;;  %v1397_v8 = vadd.f32 %v3146_v6, %v2880_v5 }
 0x643   : > { %v1392_v9 = vadd.f32 %v2880_v5, %v1391_v7 }
 0x644   : > { %v1401_v12 = vadd.f32 %v1397_v8, %v3860_v26  ;;  %v1447_v26 = vld [vmem:[%s4344_s9] sm:$0xff] }
 0x645   : > { %v1400_v10 = vadd.f32 %v1392_v9, %v3858_v25  ;;  %v3321_v23 = vpack.c.bf16 %v1448_v22, %v1447_v26 }
 0x646   : > { %v1407_v13 = vsel %vm833_vm2, %v1401_v12, 0.0 }
 0x647   : > { %v1404_v11 = vsel %vm833_vm2, %v1400_v10, 0.0  ;;  %3322 = vmatprep.subr.bf16.mxu0 %v3321_v23 }
 0x648   : > { %1405 = vadd.xlane.f32.xlu1 %v1404_v11  ;;  %3324 = vmatpush3.bf16.msra.mxu0 %v3321_v23  ;;  %v2888_v23 = vld [vmem:[%s4347_s12] ss:$0 sm:$0xff] }
 0x649   : > { %3326 = vmatprep.subr.bf16.mxu0 %v3325_v28 }
 0x64c   : > { %1408 = vadd.xlane.f32.xlu1 %v1407_v13  ;;  %3328 = vmatpush3.bf16.msra.mxu0 %v3325_v28 }
 0x6d5   : > { %v1406_v33 = vpop.xlane.xlu1 %1405 }
 0x6d6   : > { %v1411_v14 = vmul.f32 0.03125, %v1406_v33 }
 0x6d8   : > { %v1413_v15 = vsub.f32 %v1400_v10, %v1411_v14 }
 0x6d9   : > { %v1409_v16 = vpop.xlane.xlu1 %1408 }
 0x6da   : > { %v1412_v17 = vmul.f32 0.03125, %v1409_v16  ;;  %v1415_v18 = vmul.f32 %v1413_v15, %v1413_v15 }
 0x6dc   : > { %v1414_v19 = vsub.f32 %v1401_v12, %v1412_v17  ;;  %v1417_v20 = vsel %vm833_vm2, %v1415_v18, 0.0 }
 0x6dd   : > { %1418 = vadd.xlane.f32.xlu1 %v1417_v20 }
 0x6de   : > { %v1416_v21 = vmul.f32 %v1414_v19, %v1414_v19 }
 0x6e0   : > { %v1420_v25 = vsel %vm833_vm2, %v1416_v21, 0.0 }
 0x6e1   : > { %1421 = vadd.xlane.f32.xlu1 %v1420_v25 }
 0x76a   : > { %v1419_v29 = vpop.xlane.xlu1 %1418 }
 0x76b   : > { %v1423_v30 = vmul.f32 0.03125, %v1419_v29 }
 0x76d   : > { %v1425_v32 = vadd.f32 1e-05, %v1423_v30 }
 0x76e   : > { %v1422_v34 = vpop.xlane.xlu1 %1421 }
 0x76f   : > { %3503 = vrsqrt.f32 %v1425_v32  ;;  %v1424_v35 = vmul.f32 0.03125, %v1422_v34 }
 0x771   : > { %v1426_v36 = vadd.f32 1e-05, %v1424_v35 }
 0x773   : > { %3505 = vrsqrt.f32 %v1426_v36 }
 0x779   : > { %v3504_v37 = vpop.eup %3503 }
 0x77a   : > { %v1429_v42 = vmul.f32 %v3504_v37, %v1413_v15 }
 0x77c   : > { %v1437_v46 = vmul.f32 %v2883_v39, %v1429_v42 }
 0x77d   : > { %v3506_v47 = vpop.eup %3505 }
 0x77e   : > { %v1430_v50 = vmul.f32 %v3506_v47, %v1414_v19  ;;  %v1445_v51 = vadd.f32 %v2884_v43, %v1437_v46 }
 0x780   : > { %v1438_v53 = vmul.f32 %v2883_v39, %v1430_v50  ;;  %3155 = vmatprep.mubr.msk.f32.mxu0 %vm833_vm2, %v1445_v51 }
 0x782   : > { %v1446_v54 = vadd.f32 %v2884_v43, %v1438_v53 }
 0x784   : > { %3156 = vmatmul.mubr.msk.f32.vlgmr.msra.gmra.mrb[10].mxu0 %vm833_vm2, %v1446_v54 }
 0x857   : > { %v3157_v4 = vpop.f32.mrb[10].mxu0 }
 0x858   : > { %v1536_v5 = vadd.f32 %v3157_v4, %v2885_v3  ;;  %v1530_v6 = vpop.f32.mrb[11].mxu0 }
 0x859   : > { %v1531_v7 = vadd.f32 %v2885_v3, %v1530_v6  ;;  %v2891_v3 = vld [vmem:[%s4350_s15] ss:$0 sm:$0xff] }
 0x85a   : > { %v1542_v8 = vmul.f32 0.044715, %v1536_v5  ;;  %v1540_v25 = vmul.f32 0.5, %v1536_v5 }
 0x85b   : > { %v1541_v9 = vmul.f32 0.044715, %v1531_v7  ;;  %v1539_v20 = vmul.f32 0.5, %v1531_v7 }
 0x85c   : > { %v1544_v10 = vmul.f32 %v1542_v8, %v1536_v5 }
 0x85d   : > { %v1543_v11 = vmul.f32 %v1541_v9, %v1531_v7 }
 0x85e   : > { %v1546_v12 = vmul.f32 %v1544_v10, %v1536_v5 }
 0x85f   : > { %v1545_v13 = vmul.f32 %v1543_v11, %v1531_v7 }
 0x860   : > { %v1548_v33 = vadd.f32 %v1546_v12, %v1536_v5  ;;  %v2892_v5 = vld [vmem:[%s4351_s16] ss:$0 sm:$0xff]  ;;  %v2898_v12 = vld [vmem:[%s4401_s6 + $0x1] ss:$0 sm:$0xff] }
 0x861   : > { %v1547_v14 = vadd.f32 %v1545_v13, %v1531_v7 }
 0x862   : > { %v1550_v15 = vmul.f32 0.7978846, %v1548_v33 }
 0x863   : > { %v1549_v16 = vmul.f32 0.7978846, %v1547_v14 }
 0x864   : > { %3507 = vtanh.f32 %v1550_v15 }
 0x865   : > { %3509 = vtanh.f32 %v1549_v16 }
 0x86e   : > { %v3508_v17 = vpop.eup %3507 }
 0x86f   : > { %v3510_v18 = vpop.eup %3509  ;;  %v1554_v19 = vadd.f32 1.0, %v3508_v17 }
 0x870   : > { %v1553_v21 = vadd.f32 1.0, %v3510_v18 }
 0x871   : > { %v1556_v22 = vmul.f32 %v1554_v19, %v1540_v25 }
 0x872   : > { %v1555_v26 = vmul.f32 %v1553_v21, %v1539_v20 }
 0x874   : > { %3174 = vmatprep.mubr.msk.f32.mxu1 %vm1572_vm5, %v1555_v26 }
 0x875   : > { %3175 = vmatmul.mubr.msk.f32.vlgmr.msra.gmra.mrb[12].mxu1 %vm1572_vm5, %v1556_v22 }
 0x948   : > { %v3176_v24 = vpop.f32.mrb[12].mxu1 }
 0x949   : > { %v1645_v27 = vpop.f32.mrb[13].mxu1  ;;  %v1651_v28 = vadd.f32 %v3176_v24, %v2888_v23 }
 0x94a   : > { %v1646_v29 = vadd.f32 %v2888_v23, %v1645_v27 }
 0x94b   : > { %v1655_v34 = vadd.f32 %v1651_v28, %v1446_v54  ;;  %v2893_v54 = vld [vmem:[%s4397_s27 + $0x20] sm:$0xff] }
 0x94c   : > { %v1654_v30 = vadd.f32 %v1646_v29, %v1445_v51  ;;  %v3345_v56 = vpack.c.bf16 %v2894_v55, %v2893_v54 }
 0x94d   : > { %v1661_v35 = vsel %vm833_vm2, %v1655_v34, 0.0 }
 0x94e   : > { %v1658_v32 = vsel %vm833_vm2, %v1654_v30, 0.0  ;;  %3346 = vmatprep.subr.bf16.mxu0 %v3345_v56 }
 0x94f   : > { %1659 = vadd.xlane.f32.xlu1 %v1658_v32  ;;  %3348 = vmatpush3.bf16.msra.mxu0 %v3345_v56 }
 0x950   : > { %3350 = vmatprep.subr.bf16.mxu0 %v3349_v59 }
 0x953   : > { %1662 = vadd.xlane.f32.xlu1 %v1661_v35  ;;  %3352 = vmatpush3.bf16.msra.mxu0 %v3349_v59 }
 0x9dc   : > { %v1660_v36 = vpop.xlane.xlu1 %1659 }
 0x9dd   : > { %v1664_v37 = vmul.f32 0.03125, %v1660_v36 }
 0x9df   : > { %v1666_v39 = vsub.f32 %v1654_v30, %v1664_v37 }
 0x9e0   : > { %v1663_v42 = vpop.xlane.xlu1 %1662 }
 0x9e1   : > { %v1665_v43 = vmul.f32 0.03125, %v1663_v42  ;;  %v1668_v46 = vmul.f32 %v1666_v39, %v1666_v39 }
 0x9e3   : > { %v1667_v47 = vsub.f32 %v1655_v34, %v1665_v43  ;;  %v1670_v50 = vsel %vm833_vm2, %v1668_v46, 0.0 }
 0x9e4   : > { %1671 = vadd.xlane.f32.xlu0 %v1670_v50 }
 0x9e5   : > { %v1669_v53 = vmul.f32 %v1667_v47, %v1667_v47 }
 0x9e7   : > { %v1673_v51 = vsel %vm833_vm2, %v1669_v53, 0.0 }
 0x9e8   : > { %1674 = vadd.xlane.f32.xlu1 %v1673_v51 }
 0xa71   : > { %v1672_v60 = vpop.xlane.xlu0 %1671 }
 0xa72   : > { %v1676_v61 = vmul.f32 0.03125, %v1672_v60 }
 0xa74   : > { %v1678_v62 = vadd.f32 1e-05, %v1676_v61 }
 0xa75   : > { %v1675_v63 = vpop.xlane.xlu1 %1674 }
 0xa76   : > { %3511 = vrsqrt.f32 %v1678_v62  ;;  %v1677_v0 = vmul.f32 0.03125, %v1675_v63 }
 0xa78   : > { %v1679_v1 = vadd.f32 1e-05, %v1677_v0 }
 0xa7a   : > { %3513 = vrsqrt.f32 %v1679_v1 }
 0xa80   : > { %v3512_v2 = vpop.eup %3511 }
 0xa81   : > { %v1682_v4 = vmul.f32 %v3512_v2, %v1666_v39 }
 0xa83   : > { %v1690_v6 = vmul.f32 %v2891_v3, %v1682_v4 }
 0xa84   : > { %v3514_v7 = vpop.eup %3513 }
 0xa85   : > { %v1683_v8 = vmul.f32 %v3514_v7, %v1667_v47  ;;  %v4070_v9 = vadd.f32 %v2892_v5, %v1690_v6 }
 0xa87   : > { %v1691_v10 = vmul.f32 %v2891_v3, %v1683_v8  ;;  %3185 = vmatprep.mubr.msk.f32.mxu0 %vm833_vm2, %v4070_v9 }
 0xa89   : > { %v4074_v11 = vadd.f32 %v2892_v5, %v1691_v10 }
 0xa8b   : > { %3186 = vmatmul.mubr.msk.f32.vlgmr.msra.gmra.mrb[12].mxu0 %vm833_vm2, %v4074_v11 }
 0xb5e   : > { %v3187_v13 = vpop.f32.mrb[12].mxu0 }
 0xb5f   : > { %v1791_v33 = vadd.f32 %v3187_v13, %v2898_v12  ;;  %v1785_v14 = vpop.f32.mrb[13].mxu0 }
 0xb60   : > { %v1786_v15 = vadd.f32 %v2898_v12, %v1785_v14 }
 0xb61   : > { %v1795_v25 = vmul.f32 %v1791_v33, %v3893_v40  ;;  %v1799_v23 = vmul.f32 %v1791_v33, %v3919_v48  ;;  %v1801_v40 = vmul.f32 %v1791_v33, %v3933_v52 }
 0xb62   : > { %v4081_v16 = vpack.i.bf16 %v1791_v33, %v1786_v15  ;;  %v1794_v17 = vmul.f32 %v1786_v15, %v3872_v31  ;;  %v1796_v26 = vmul.f32 %v1786_v15, %v3898_v41  ;;  %v1797_v31 = vmul.f32 %v1791_v33, %v3905_v44 }
 0xb63   : > { %v1798_v22 = vmul.f32 %v1786_v15, %v3911_v45  ;;  %v1800_v38 = vmul.f32 %v1786_v15, %v3925_v49 }
 0xb64   : > { %3462 = vrot.lane.b32.xlu1 %v4081_v16, %s4406_s29  ;;  %3192 = vmatprep.mubr.msk.f32.mxu0 %vm833_vm2, %v1794_v17  ;;  %s2957_s29 = sshll.u32 %s3782_s5, 4  ;;  %s3640_s5 = smov [#allocation2]  }
 0xbd6   : > { %v3463_v18 = vpop.permute.xlu1 %3462 }
 0xbd7   : > { %v3465_v19 = vunpack.i.h.bf16 %v3463_v18  ;;  %v3464_v20 = vunpack.i.l.bf16 %v3463_v18 }
 0xbd9   : > { %v3353_v21 = vpack.c.bf16 %v3465_v19, %v3464_v20 }
 0xbdb   : > { %3355 = vmatprep.subr.msk.bf16.mxu0 %vm3882_vm3, %v3353_v21 }
 0xbdc   : > { %3358 = vmatpush3.bf16.xpose.msk.msra.mxu0 %vm3882_vm3, %v3353_v21 }
 0xbe3   : > { %3193 = vmatmul.mubr.msk.f32.vlgmr.msra.gmra.mrb[14].mxu0 %vm833_vm2, %v1795_v25 }
 0xbe4   : > { %3195 = vmatprep.mubr.msk.f32.mxu0 %vm833_vm2, %v1796_v26 }
 0xbe7   : > { %3196 = vmatmul.mubr.msk.f32.gmra.mrb[16].mxu0 %vm833_vm2, %v1797_v31 }
 0xbe8   : > { %3198 = vmatprep.mubr.msk.f32.mxu0 %vm833_vm2, %v1798_v22 }
 0xbeb   : > { %3199 = vmatmul.mubr.msk.f32.gmra.mrb[18].mxu0 %vm833_vm2, %v1799_v23 }
 0xbec   : > { %3201 = vmatprep.mubr.msk.f32.mxu0 %vm833_vm2, %v1800_v38 }
 0xbef   : > { %3202 = vmatmul.mubr.msk.f32.gmra.mrb[20].mxu0 %vm833_vm2, %v1801_v40 }
 0xcb6   : > { %v3194_v41 = vpop.f32.mrb[14].mxu0 }
 0xcb7   : > { %v1942_v44 = vmul.f32 0.35355338, %v3194_v41  ;;  %v1902_v24 = vpop.f32.mrb[15].mxu0 }
 0xcb8   : > { %v1941_v45 = vmul.f32 0.35355338, %v1902_v24 }
 0xcb9   : > { %v1952_v27 = vsel %vm1070_vm4, %v1942_v44, -inf }
 0xcba   : > { %1953 = vmax.xlane.f32.xlu0 %v1952_v27  ;;  %v3197_v28 = vpop.f32.mrb[16].mxu0  ;;  %v1949_v48 = vsel %vm1070_vm4, %v1941_v45, -inf }
 0xcbb   : > { %v1944_v29 = vmul.f32 0.35355338, %v3197_v28  ;;  %1950 = vmax.xlane.f32.xlu1 %v1949_v48  ;;  %v1912_v49 = vpop.f32.mrb[17].mxu0 }
 0xcbc   : > { %v1943_v30 = vmul.f32 0.35355338, %v1912_v49 }
 0xcbd   : > { %v1958_v32 = vsel %vm1070_vm4, %v1944_v29, -inf }
 0xcbe   : > { %1959 = vmax.xlane.f32.xlu0 %v1958_v32  ;;  %v3200_v52 = vpop.f32.mrb[18].mxu0  ;;  %v1955_v36 = vsel %vm1070_vm4, %v1943_v30, -inf }
 0xcbf   : > { %v1922_v34 = vpop.f32.mrb[19].mxu0  ;;  %v1946_v35 = vmul.f32 0.35355338, %v3200_v52 }
 0xcc0   : > { %v1945_v42 = vmul.f32 0.35355338, %v1922_v34 }
 0xcc1   : > { %v1964_v43 = vsel %vm1070_vm4, %v1946_v35, -inf }
 0xcc2   : > { %1956 = vmax.xlane.f32.xlu0 %v1955_v36  ;;  %v3203_v37 = vpop.f32.mrb[20].mxu0  ;;  %v1961_v47 = vsel %vm1070_vm4, %v1945_v42, -inf }
 0xcc3   : > { %v1932_v39 = vpop.f32.mrb[21].mxu0  ;;  %v1948_v50 = vmul.f32 0.35355338, %v3203_v37 }
 0xcc4   : > { %v1947_v46 = vmul.f32 0.35355338, %v1932_v39 }
 0xcc5   : > { %v1970_v51 = vsel %vm1070_vm4, %v1948_v50, -inf }
 0xcc6   : > { %1965 = vmax.xlane.f32.xlu0 %v1964_v43  ;;  %v1967_v53 = vsel %vm1070_vm4, %v1947_v46, -inf }
 0xcca   : > { %1962 = vmax.xlane.f32.xlu0 %v1961_v47 }
 0xcce   : > { %1968 = vmax.xlane.f32.xlu0 %v1967_v53 }
 0xcd2   : > { %1971 = vmax.xlane.f32.xlu0 %v1970_v51 }
 0xd47   : > { %v1954_v54 = vpop.xlane.xlu0 %1953 }
 0xd48   : > { %v1974_v55 = vsub.f32 %v1942_v44, %v1954_v54  ;;  %v1951_v56 = vpop.xlane.xlu1 %1950 }
 0xd49   : > { %v1973_v57 = vsub.f32 %v1941_v45, %v1951_v56 }
 0xd4a   : > { %v1983_v58 = vmul.f32 1.442695, %v1974_v55 }
 0xd4b   : > { %v1981_v59 = vmul.f32 1.442695, %v1973_v57  ;;  %v1960_v60 = vpop.xlane.xlu0 %1959 }
 0xd4c   : > { %3515 = vpow2.f32 %v1983_v58  ;;  %v1976_v61 = vsub.f32 %v1944_v29, %v1960_v60  ;;  %v2919_v60 = vld [vmem:[%s4405_s1 + $0x20] sm:$0xff] }
 0xd4d   : > { %3517 = vpow2.f32 %v1981_v59 }
 0xd4e   : > { %v1987_v62 = vmul.f32 1.442695, %v1976_v61  ;;  %v2920_v61 = vld [vmem:[%s4405_s1 + $0x28] sm:$0xff] }
 0xd4f   : > { %v1957_v63 = vpop.xlane.xlu0 %1956 }
 0xd50   : > { %3519 = vpow2.f32 %v1987_v62  ;;  %v1975_v0 = vsub.f32 %v1943_v30, %v1957_v63  ;;  %v3363_v62 = vpack.c.bf16 %v2920_v61, %v2919_v60  ;;  %v2921_v63 = vld [vmem:[%s4405_s1 + $0x30] sm:$0xff] }
 0xd52   : > { %v1985_v1 = vmul.f32 1.442695, %v1975_v0  ;;  %3364 = vmatprep.subr.bf16.mxu0 %v3363_v62  ;;  %v2922_v0 = vld [vmem:[%s4405_s1 + $0x38] sm:$0xff]  ;;  %s4293_s1 = scalar_lea.hbm %s4409_s2, %s2957_s29 }
 0xd53   : > { %v1966_v2 = vpop.xlane.xlu0 %1965  ;;  %3366 = vmatpush3.bf16.msra.mxu0 %v3363_v62 }
 0xd54   : > { %3521 = vpow2.f32 %v1985_v1  ;;  %v1978_v3 = vsub.f32 %v1946_v35, %v1966_v2  ;;  %v3367_v1 = vpack.c.bf16 %v2922_v0, %v2921_v63  ;;  %v2929_v0 = vld [vmem:[%s4348_s13 + $0x1] ss:$0 sm:$0xff] }
 0xd56   : > { %v4113_v4 = vpop.eup %3515  ;;  %v1991_v5 = vmul.f32 1.442695, %v1978_v3  ;;  %3368 = vmatprep.subr.bf16.mxu0 %v3367_v1 }
 0xd57   : > { %v3518_v6 = vpop.eup %3517  ;;  %v1963_v7 = vpop.xlane.xlu0 %1962  ;;  %v2000_v8 = vsel %vm1070_vm4, %v4113_v4, 0.0  ;;  %3370 = vmatpush3.bf16.msra.mxu0 %v3367_v1 }
 0xd58   : > { %3523 = vpow2.f32 %v1991_v5  ;;  %v1977_v10 = vsub.f32 %v1945_v42, %v1963_v7  ;;  %2001 = vadd.xlane.f32.xlu1 %v2000_v8  ;;  %v1997_v12 = vsel %vm1070_vm4, %v3518_v6, 0.0  ;;  %v3563_v5 = vld [vmem:[%s4402_s26 + $0x8] sm:$0xff]  ;;  %v3564_v7 = vld [vmem:[%s4402_s26 + $0x18] sm:$0xff] }
 0xd59   : > { %1998 = vadd.xlane.f32.xlu0 %v1997_v12  ;;  %v3565_v12 = vld [vmem:[%s4402_s26] sm:$0xff] }
 0xd5a   : > { %v3520_v13 = vpop.eup %3519  ;;  %v1989_v33 = vmul.f32 1.442695, %v1977_v10 }
 0xd5b   : > { %v1969_v14 = vpop.xlane.xlu0 %1968  ;;  %v2006_v15 = vsel %vm1070_vm4, %v3520_v13, 0.0 }
 0xd5c   : > { %3525 = vpow2.f32 %v1989_v33  ;;  %v1979_v17 = vsub.f32 %v1947_v46, %v1969_v14  ;;  %2007 = vadd.xlane.f32.xlu1 %v2006_v15  ;;  %v3566_v33 = vld [vmem:[%s4402_s26 + $0x10] sm:$0xff] }
 0xd5e   : > { %v3522_v18 = vpop.eup %3521  ;;  %v1993_v19 = vmul.f32 1.442695, %v1979_v17 }
 0xd5f   : > { %v1972_v20 = vpop.xlane.xlu0 %1971  ;;  %v2003_v21 = vsel %vm1070_vm4, %v3522_v18, 0.0 }
 0xd60   : > { %3527 = vpow2.f32 %v1993_v19  ;;  %v1980_v25 = vsub.f32 %v1948_v50, %v1972_v20  ;;  %2004 = vadd.xlane.f32.xlu0 %v2003_v21  ;;  %v3567_v19 = vld [vmem:[%s4402_s26 + $0x28] sm:$0xff] }
 0xd62   : > { %v3524_v26 = vpop.eup %3523  ;;  %v1995_v31 = vmul.f32 1.442695, %v1980_v25  ;;  %v3568_v25 = vld [vmem:[%s4402_s26 + $0x20] sm:$0xff] }
 0xd63   : > { %v2012_v22 = vsel %vm1070_vm4, %v3524_v26, 0.0 }
 0xd64   : > { %3529 = vpow2.f32 %v1995_v31  ;;  %2013 = vadd.xlane.f32.xlu1 %v2012_v22 }
 0xd66   : > { %v3526_v23 = vpop.eup %3525 }
 0xd67   : > { %v2009_v38 = vsel %vm1070_vm4, %v3526_v23, 0.0 }
 0xd68   : > { %2010 = vadd.xlane.f32.xlu0 %v2009_v38  ;;  %v3569_v38 = vld [vmem:[%s4402_s26 + $0x38] sm:$0xff] }
 0xd6a   : > { %v3528_v40 = vpop.eup %3527 }
 0xd6b   : > { %v2015_v41 = vsel %vm1070_vm4, %v3528_v40, 0.0 }
 0xd6c   : > { %2016 = vadd.xlane.f32.xlu0 %v2015_v41 }
 0xd6e   : > { %v3530_v44 = vpop.eup %3529 }
 0xd6f   : > { %v2018_v24 = vsel %vm1070_vm4, %v3530_v44, 0.0 }
 0xd70   : > { %2019 = vadd.xlane.f32.xlu1 %v2018_v24 }
 0xd82   : > { %3467 = vrot.lane.b32.xlu0 %v4081_v16, %s4407_s25  ;;  %s702_s25 = scalar_lea.vmem [#allocation2], %s701_s24 }
 0xd83   : > { %s2794_s22 = sshll.u32 %s702_s25, 4  ;;  %s4295_s22 = int_to_ptr.vmem [resolvable:$true] %s2794_s22 }
 0xd84   : > { %s3571_s0 = scalar_lea.vmem %s4295_s22, 16 }
 0xd85   : > { %p3572_p11 = scmp.ne.s32.totalorder %s4295_s22, %s3571_s0 }
 0xd87   : > { %p3573_p12 = pnand %p3572_p11, %p3799_p5 }
 0xd89   : > { %p3574_p13 = pneg %p3573_p12 }
 0xde5   : > { %v2002_v48 = vpop.xlane.xlu1 %2001 }
 0xde6   : > { %v1999_v45 = vpop.xlane.xlu0 %1998 }
 0xde7   : > { %3531 = vrcp.f32 %v1999_v45 }
 0xde8   : > { %3533 = vrcp.f32 %v2002_v48 }
 0xde9   : > { %v2008_v30 = vpop.xlane.xlu1 %2007 }
 0xded   : > { %v2005_v28 = vpop.xlane.xlu0 %2004 }
 0xdee   : > { %3535 = vrcp.f32 %v2005_v28  ;;  %v2924_v28 = vld [vmem:[%s4343_s8 + $0x1] ss:$0 sm:$0xff] }
 0xdef   : > { %3537 = vrcp.f32 %v2008_v30 }
 0xdf1   : > { %v3532_v27 = vpop.eup %3531  ;;  %v2014_v52 = vpop.xlane.xlu1 %2013 }
 0xdf2   : > { %v2029_v29 = vmul.f32 %v3532_v27, %v3518_v6  ;;  %v3534_v39 = vpop.eup %3533 }
 0xdf3   : > { %v2030_v43 = vmul.f32 %v3534_v39, %v4113_v4 }
 0xdf4   : > { %3208 = vmatprep.mubr.msk.f32.mxu1 %vm1070_vm4, %v2029_v29 }
 0xdf5   : > { %v2011_v49 = vpop.xlane.xlu0 %2010 }
 0xdf6   : > { %3539 = vrcp.f32 %v2011_v49 }
 0xdf7   : > { %3541 = vrcp.f32 %v2014_v52 }
 0xdf8   : > { %v3536_v42 = vpop.eup %3535 }
 0xdf9   : > { %v2017_v32 = vpop.xlane.xlu0 %2016  ;;  %v3538_v46 = vpop.eup %3537  ;;  %v2031_v47 = vmul.f32 %v3536_v42, %v3522_v18 }
 0xdfa   : > { %3543 = vrcp.f32 %v2017_v32  ;;  %v2032_v53 = vmul.f32 %v3538_v46, %v3520_v13 }
 0xdfd   : > { %v3468_v34 = vpop.permute.xlu0 %3467  ;;  %v2020_v16 = vpop.xlane.xlu1 %2019 }
 0xdfe   : > { %v3470_v35 = vunpack.i.h.bf16 %v3468_v34  ;;  %v3469_v36 = vunpack.i.l.bf16 %v3468_v34  ;;  %3545 = vrcp.f32 %v2020_v16 }
 0xe00   : > { %v3359_v37 = vpack.c.bf16 %v3470_v35, %v3469_v36  ;;  %v3540_v50 = vpop.eup %3539 }
 0xe01   : > { %v3542_v51 = vpop.eup %3541  ;;  %v2033_v54 = vmul.f32 %v3540_v50, %v3526_v23 }
 0xe02   : > { %3360 = vmatprep.subr.bf16.mxu1 %v3359_v37  ;;  %v2034_v56 = vmul.f32 %v3542_v51, %v3524_v26 }
 0xe03   : > { %3362 = vmatpush3.bf16.msra.mxu1 %v3359_v37 }
 0xe04   : > { %v3544_v55 = vpop.eup %3543 }
 0xe05   : > { %v2035_v58 = vmul.f32 %v3544_v55, %v3528_v40  ;;  %v2934_v55 = vld [vmem:[%s4344_s9 + $0x38] sm:$0xff] }
 0xe06   : > { %3209 = vmatmul.mubr.msk.f32.vlgmr.msra.gmra.mrb[14].mxu1 %vm1070_vm4, %v2030_v43 }
 0xe07   : > { %3211 = vmatprep.mubr.msk.f32.mxu1 %vm1070_vm4, %v2031_v47 }
 0xe08   : > { %v3546_v57 = vpop.eup %3545 }
 0xe09   : > { %v2036_v59 = vmul.f32 %v3546_v57, %v3530_v44  ;;  %v3570_v44 = vld [vmem:[%s4402_s26 + $0x30] sm:$0xff] }
 0xe0a   : > { %3212 = vmatmul.mubr.msk.f32.gmra.mrb[16].mxu1 %vm1070_vm4, %v2032_v53  ;;  %v2932_v53 = vld [vmem:[%s4344_s9 + $0x28] sm:$0xff] }
 0xe0b   : > { %3214 = vmatprep.mubr.msk.f32.mxu1 %vm1070_vm4, %v2033_v54  ;;  %v2933_v54 = vld [vmem:[%s4344_s9 + $0x30] sm:$0xff] }
 0xe0e   : > { %3215 = vmatmul.mubr.msk.f32.gmra.mrb[18].mxu1 %vm1070_vm4, %v2034_v56  ;;  %v3375_v56 = vpack.c.bf16 %v2934_v55, %v2933_v54 }
 0xe0f   : > { %3217 = vmatprep.mubr.msk.f32.mxu1 %vm1070_vm4, %v2035_v58 }
 0xe12   : > { %3218 = vmatmul.mubr.msk.f32.gmra.mrb[20].mxu1 %vm1070_vm4, %v2036_v59 }
 0xed9   : > { %v3210_v2 = vpop.f32.mrb[14].mxu1 }
 0xeda   : > { %v2133_v3 = vpop.f32.mrb[15].mxu1  ;;  %v2173_v6 = vmul.f32 %v3563_v5, %v3210_v2  ;;  %v2930_v2 = vld [vmem:[%s4349_s14 + $0x1] ss:$0 sm:$0xff] }
 0xedb   : > { %v2172_v13 = vmul.f32 %v3565_v12, %v2133_v3  ;;  %v2940_v12 = vld [vmem:[%s4346_s11 + $0x48] sm:$0xff] }
 0xedd   : > { %v3213_v4 = vpop.f32.mrb[16].mxu1 }
 0xede   : > { %v2175_v8 = vmul.f32 %v3564_v7, %v3213_v4  ;;  %v2143_v10 = vpop.f32.mrb[17].mxu1 }
 0xedf   : > { %v2174_v14 = vmul.f32 %v3566_v33, %v2143_v10  ;;  %v2939_v10 = vld [vmem:[%s4346_s11 + $0x40] sm:$0xff]  ;;  %v2941_v33 = vld [vmem:[%s4346_s11 + $0x50] sm:$0xff] }
 0xee0   : > { %v2181_v15 = vadd.f32 %v2175_v8, %v2173_v6 }
 0xee1   : > { %v2180_v17 = vadd.f32 %v2174_v14, %v2172_v13  ;;  %v3216_v18 = vpop.f32.mrb[18].mxu1  ;;  %v3379_v13 = vpack.c.bf16 %v2940_v12, %v2939_v10  ;;  %v2942_v14 = vld [vmem:[%s4346_s11 + $0x58] sm:$0xff]  ;;  %v2954_v12 = vld [vmem:[%s4351_s16 + $0x1] ss:$0 sm:$0xff] }
 0xee2   : > { %v2177_v20 = vmul.f32 %v3567_v19, %v3216_v18  ;;  %v2153_v21 = vpop.f32.mrb[19].mxu1  ;;  %v2944_v18 = vld [vmem:[%s4346_s11 + $0x68] sm:$0xff] }
 0xee3   : > { %v2176_v26 = vmul.f32 %v3568_v25, %v2153_v21  ;;  %3380 = vmatprep.subr.bf16.mxu0 %v3379_v13  ;;  %v2946_v21 = vld [vmem:[%s4346_s11 + $0x78] sm:$0xff] }
 0xee4   : > { %v2183_v31 = vadd.f32 %v2181_v15, %v2177_v20  ;;  %v3383_v15 = vpack.c.bf16 %v2942_v14, %v2941_v33  ;;  %v2945_v20 = vld [vmem:[%s4346_s11 + $0x70] sm:$0xff] }
 0xee5   : > { %v2182_v22 = vadd.f32 %v2180_v17, %v2176_v26  ;;  %v3219_v23 = vpop.f32.mrb[20].mxu1  ;;  %v2943_v17 = vld [vmem:[%s4346_s11 + $0x60] sm:$0xff]  ;;  %v3391_v25 = vpack.c.bf16 %v2946_v21, %v2945_v20 }
 0xee6   : > { %v2179_v40 = vmul.f32 %v3569_v38, %v3219_v23  ;;  %v2163_v41 = vpop.f32.mrb[21].mxu1  ;;  %v3387_v19 = vpack.c.bf16 %v2944_v18, %v2943_v17  ;;  %v2936_v26 = vld [vmem:[%s4345_s10 + $0x1] ss:$0 sm:$0xff] }
 0xee7   : > { %v2178_v24 = vmul.f32 %v3570_v44, %v2163_v41 }
 0xee8   : > { %v2185_v45 = vadd.f32 %v2183_v31, %v2179_v40 }
 0xee9   : > { %v2184_v27 = vadd.f32 %v2182_v22, %v2178_v24 }
 0xeeb   : > { %3228 = vmatprep.mubr.msk.f32.mxu0 %vm833_vm2, %v2184_v27 }
 0xeec   : > { %3229 = vmatmul.mubr.msk.f32.vlgmr.msra.gmra.mrb[22].mxu0 %vm833_vm2, %v2185_v45 }
 0xeed   : > { %3382 = vmatpush3.bf16.msra.mxu0 %v3379_v13 }
 0xeee   : > { %3384 = vmatprep.subr.bf16.mxu0 %v3383_v15 }
 0xef1   : > { %3386 = vmatpush3.bf16.msra.mxu0 %v3383_v15 }
 0xef2   : > { %3388 = vmatprep.subr.bf16.mxu0 %v3387_v19 }
 0xef5   : > { %3390 = vmatpush3.bf16.msra.mxu0 %v3387_v19 }
 0xef6   : > { %3392 = vmatprep.subr.bf16.mxu0 %v3391_v25 }
 0xef9   : > { %3394 = vmatpush3.bf16.msra.mxu0 %v3391_v25 }
 0xfbf   : > { %v3230_v48 = vpop.f32.mrb[22].mxu0 }
 0xfc0   : > { %v2271_v29 = vpop.f32.mrb[23].mxu0  ;;  %v2277_v49 = vadd.f32 %v3230_v48, %v2924_v28 }
 0xfc1   : > { %v2272_v30 = vadd.f32 %v2924_v28, %v2271_v29 }
 0xfc2   : > { %v2281_v34 = vadd.f32 %v2277_v49, %v4074_v11  ;;  %v2931_v11 = vld [vmem:[%s4344_s9 + $0x20] sm:$0xff] }
 0xfc3   : > { %v2280_v32 = vadd.f32 %v2272_v30, %v4070_v9  ;;  %v3371_v51 = vpack.c.bf16 %v2932_v53, %v2931_v11 }
 0xfc4   : > { %v2289_v35 = vsel %vm833_vm2, %v2281_v34, 0.0 }
 0xfc5   : > { %v2286_v52 = vsel %vm833_vm2, %v2280_v32, 0.0  ;;  %3372 = vmatprep.subr.bf16.mxu1 %v3371_v51 }
 0xfc6   : > { %2287 = vadd.xlane.f32.xlu1 %v2286_v52  ;;  %3374 = vmatpush3.bf16.msra.mxu1 %v3371_v51 }
 0xfc7   : > { %3376 = vmatprep.subr.bf16.mxu1 %v3375_v56 }
 0xfca   : > { %2290 = vadd.xlane.f32.xlu1 %v2289_v35  ;;  %3378 = vmatpush3.bf16.msra.mxu1 %v3375_v56 }
0x1053   : > { %v2288_v36 = vpop.xlane.xlu1 %2287 }
0x1054   : > { %v2292_v16 = vmul.f32 0.03125, %v2288_v36 }
0x1056   : > { %v2294_v37 = vsub.f32 %v2280_v32, %v2292_v16 }
0x1057   : > { %v2291_v39 = vpop.xlane.xlu1 %2290 }
0x1058   : > { %v2293_v42 = vmul.f32 0.03125, %v2291_v39  ;;  %v2296_v43 = vmul.f32 %v2294_v37, %v2294_v37  ;;  %v2948_v39 = vld [vmem:[%s4347_s12 + $0x1] ss:$0 sm:$0xff] }
0x105a   : > { %v2295_v46 = vsub.f32 %v2281_v34, %v2293_v42  ;;  %v2298_v47 = vsel %vm833_vm2, %v2296_v43, 0.0 }
0x105b   : > { %2299 = vadd.xlane.f32.xlu1 %v2298_v47 }
0x105c   : > { %v2297_v50 = vmul.f32 %v2295_v46, %v2295_v46 }
0x105e   : > { %v2301_v9 = vsel %vm833_vm2, %v2297_v50, 0.0 }
0x105f   : > { %2302 = vadd.xlane.f32.xlu1 %v2301_v9 }
0x10e8   : > { %v2300_v57 = vpop.xlane.xlu1 %2299 }
0x10e9   : > { %v2304_v58 = vmul.f32 0.03125, %v2300_v57 }
0x10eb   : > { %v2306_v59 = vadd.f32 1e-05, %v2304_v58 }
0x10ec   : > { %v2303_v60 = vpop.xlane.xlu1 %2302 }
0x10ed   : > { %3547 = vrsqrt.f32 %v2306_v59  ;;  %v2305_v61 = vmul.f32 0.03125, %v2303_v60 }
0x10ef   : > { %v2307_v62 = vadd.f32 1e-05, %v2305_v61 }
0x10f1   : > { %3549 = vrsqrt.f32 %v2307_v62 }
0x10f7   : > { %v3548_v63 = vpop.eup %3547 }
0x10f8   : > { %v2310_v1 = vmul.f32 %v3548_v63, %v2294_v37 }
0x10fa   : > { %v2318_v3 = vmul.f32 %v2929_v0, %v2310_v1 }
0x10fb   : > { %v3550_v4 = vpop.eup %3549 }
0x10fc   : > { %v2311_v5 = vmul.f32 %v3550_v4, %v2295_v46  ;;  %v2326_v6 = vadd.f32 %v2930_v2, %v2318_v3 }
0x10fe   : > { %v2319_v7 = vmul.f32 %v2929_v0, %v2311_v5  ;;  %3239 = vmatprep.mubr.msk.f32.mxu1 %vm833_vm2, %v2326_v6 }
0x1100   : > { %v2327_v8 = vadd.f32 %v2930_v2, %v2319_v7 }
0x1102   : > { %3240 = vmatmul.mubr.msk.f32.vlgmr.msra.gmra.mrb[22].mxu1 %vm833_vm2, %v2327_v8 }
0x11d5   : > { %v3241_v31 = vpop.f32.mrb[22].mxu1 }
0x11d6   : > { %v2419_v22 = vadd.f32 %v3241_v31, %v2936_v26  ;;  %v2413_v23 = vpop.f32.mrb[23].mxu1 }
0x11d7   : > { %v2414_v38 = vadd.f32 %v2936_v26, %v2413_v23 }
0x11d8   : > { %v2425_v40 = vmul.f32 0.044715, %v2419_v22  ;;  %v2423_v36 = vmul.f32 0.5, %v2419_v22 }
0x11d9   : > { %v2424_v41 = vmul.f32 0.044715, %v2414_v38  ;;  %v2422_v34 = vmul.f32 0.5, %v2414_v38 }
0x11da   : > { %v2427_v44 = vmul.f32 %v2425_v40, %v2419_v22 }
0x11db   : > { %v2426_v24 = vmul.f32 %v2424_v41, %v2414_v38 }
0x11dc   : > { %v2429_v45 = vmul.f32 %v2427_v44, %v2419_v22 }
0x11dd   : > { %v2428_v27 = vmul.f32 %v2426_v24, %v2414_v38 }
0x11de   : > { %v2431_v28 = vadd.f32 %v2429_v45, %v2419_v22 }
0x11df   : > { %v2430_v48 = vadd.f32 %v2428_v27, %v2414_v38  ;;  %v2614_v27 = vld [vmem:[%s4354_s19] sm:$0xff] }
0x11e0   : > { %v2433_v29 = vmul.f32 0.7978846, %v2431_v28  ;;  %v2615_v28 = vld [vmem:[%s4354_s19 + $0x8] sm:$0xff] }
0x11e1   : > { %v2432_v49 = vmul.f32 0.7978846, %v2430_v48  ;;  %v3396_v48 = vpack.c.bf16 %v2615_v28, %v2614_v27 }
0x11e2   : > { %3551 = vtanh.f32 %v2433_v29  ;;  %v3637_v29 = vmov 0.0|0.0  }
0x11e3   : > { %3553 = vtanh.f32 %v2432_v49  ;;  %3395 = vmatprep.subr.bf16.mxu1 %v3637_v29  ;;  %v2616_v49 = vld [vmem:[%s4354_s19 + $0x10] sm:$0xff] }
0x11e4   : > { %3397 = vmatpush3.bf16.msra.mxu1 %v3396_v48 }
0x11e5   : > { %3398 = vmatprep.subr.bf16.mxu1 %v3637_v29 }
0x11ec   : > { %v3552_v30 = vpop.eup %3551 }
0x11ed   : > { %v3554_v32 = vpop.eup %3553  ;;  %v2437_v52 = vadd.f32 1.0, %v3552_v30  ;;  %v2617_v30 = vld [vmem:[%s4354_s19 + $0x18] sm:$0xff] }
0x11ee   : > { %v2436_v35 = vadd.f32 1.0, %v3554_v32  ;;  %v3399_v32 = vpack.c.bf16 %v2617_v30, %v2616_v49 }
0x11ef   : > { %v2439_v37 = vmul.f32 %v2437_v52, %v2423_v36  ;;  %v3639_v52 = vmov 0.0  }
0x11f0   : > { %v2438_v16 = vmul.f32 %v2436_v35, %v2422_v34  ;;  %3269 = vmatprep.mubr.msk.f32.mxu1 %vm3638_vm6, %v3639_v52  ;;  %3400 = vmatpush3.bf16.msra.mxu1 %v3399_v32 }
0x11f1   : > { %3401 = vmatprep.subr.bf16.mxu1 %v3637_v29 }
0x11f2   : > { %3258 = vmatprep.mubr.msk.f32.mxu0 %vm1572_vm5, %v2438_v16 }
0x11f3   : > { %3259 = vmatmul.mubr.msk.f32.vlgmr.msra.gmra.mrb[24].mxu0 %vm1572_vm5, %v2439_v37  ;;  %v2597_v37 = vld [vmem:[%s4352_s17] sm:$0x1] }
0x12c6   : > { %v3260_v42 = vpop.f32.mrb[24].mxu0 }
0x12c7   : > { %v2529_v43 = vpop.f32.mrb[25].mxu0  ;;  %v2535_v46 = vadd.f32 %v3260_v42, %v2948_v39  ;;  %v2598_v42 = vld [vmem:[%s4353_s18] sm:$0x1] }
0x12c8   : > { %v2530_v47 = vadd.f32 %v2948_v39, %v2529_v43 }
0x12c9   : > { %v2539_v11 = vadd.f32 %v2535_v46, %v2327_v8 }
0x12ca   : > { %v2538_v50 = vadd.f32 %v2530_v47, %v2326_v6  ;;  %v2953_v6 = vld [vmem:[%s4350_s15 + $0x1] ss:$0 sm:$0xff] }
0x12cb   : > { %v2547_v53 = vsel %vm833_vm2, %v2539_v11, 0.0  ;;  %v2701_v47 = vld [vmem:[%s4356_s21] sm:$0xff] }
0x12cc   : > { %v2544_v9 = vsel %vm833_vm2, %v2538_v50, 0.0 }
0x12cd   : > { %2545 = vadd.xlane.f32.xlu1 %v2544_v9  ;;  %v2703_v9 = vld [vmem:[%s4356_s21 + $0x10] sm:$0xff] }
0x12d1   : > { %2548 = vadd.xlane.f32.xlu1 %v2547_v53  ;;  %v2704_v53 = vld [vmem:[%s4356_s21 + $0x18] sm:$0xff] }
0x135a   : > { %v2546_v51 = vpop.xlane.xlu1 %2545 }
0x135b   : > { %v2550_v54 = vmul.f32 0.03125, %v2546_v51  ;;  %v3405_v51 = vpack.c.bf16 %v2704_v53, %v2703_v9 }
0x135d   : > { %v2552_v55 = vsub.f32 %v2538_v50, %v2550_v54  ;;  %v2702_v50 = vld [vmem:[%s4356_s21 + $0x8] sm:$0xff]  ;;  %v2618_v54 = vld [vmem:[%s4355_s20] sm:$0x1] }
0x135e   : > { %v2549_v56 = vpop.xlane.xlu1 %2548 }
0x135f   : > { %v2551_v57 = vmul.f32 0.03125, %v2549_v56  ;;  %v2554_v58 = vmul.f32 %v2552_v55, %v2552_v55 }
0x1361   : > { %v2553_v59 = vsub.f32 %v2539_v11, %v2551_v57  ;;  %v2556_v60 = vsel %vm833_vm2, %v2554_v58, 0.0  ;;  %v3402_v11 = vpack.c.bf16 %v2702_v50, %v2701_v47 }
0x1362   : > { %2557 = vadd.xlane.f32.xlu0 %v2556_v60 }
0x1363   : > { %v2555_v61 = vmul.f32 %v2553_v59, %v2553_v59 }
0x1365   : > { %v2559_v62 = vsel %vm833_vm2, %v2555_v61, 0.0 }
0x1366   : > { %2560 = vadd.xlane.f32.xlu1 %v2559_v62 }
0x13ef   : > { %v2558_v63 = vpop.xlane.xlu0 %2557 }
0x13f0   : > { %v2562_v0 = vmul.f32 0.03125, %v2558_v63 }
0x13f2   : > { %v2564_v1 = vadd.f32 1e-05, %v2562_v0 }
0x13f3   : > { %v2561_v2 = vpop.xlane.xlu1 %2560 }
0x13f4   : > { %3555 = vrsqrt.f32 %v2564_v1  ;;  %v2563_v3 = vmul.f32 0.03125, %v2561_v2 }
0x13f6   : > { %v2565_v4 = vadd.f32 1e-05, %v2563_v3  ;;  %v2705_v3 = vld [vmem:[%s4408_s28] sm:$0x1]  ;;  %s3575_s28 = sshll.u32 %s3640_s5, 4  ;;  %s3576_s28 = int_to_ptr.vmem [resolvable:$false] %s3575_s28 }
0x13f7   : > { %s3577_s6 = scalar_lea.vmem %s3576_s28, 32  ;;  %p3578_p0 = scmp.lt.s32.totalorder %s4295_s22, %s3576_s28 }
0x13f8   : > { %3557 = vrsqrt.f32 %v2565_v4  ;;  %p3579_p1 = scmp.lt.s32.totalorder %s3577_s6, %s3571_s0 }
0x13fa   : > { %p3580_p2 = por %p3579_p1, %p3578_p0 }
0x13fc   : > { %p3581_p3 = pnand %p3580_p2, %p3574_p13 }
0x13fe   : > { %v3556_v5 = vpop.eup %3555 }
0x13ff   : > { %v2568_v7 = vmul.f32 %v3556_v5, %v2552_v55 }
0x1401   : > { %v2576_v8 = vmul.f32 %v2953_v6, %v2568_v7 }
0x1402   : > { %v3558_v10 = vpop.eup %3557 }
0x1403   : > { %v2569_v13 = vmul.f32 %v3558_v10, %v2553_v59  ;;  %v2584_v14 = vadd.f32 %v2954_v12, %v2576_v8 }
0x1405   : > { %v2577_v33 = vmul.f32 %v2953_v6, %v2569_v13  ;;  %v2586_v17 = vsel %vm833_vm2, %v2584_v14, 0.0 }
0x1407   : > { %v2585_v15 = vadd.f32 %v2954_v12, %v2577_v33 }
0x1409   : > { %v2587_v18 = vsel %vm833_vm2, %v2585_v15, 0.0 }
0x140a   : > { %v2588_v19 = vadd.f32 %v2587_v18, %v2586_v17 }
0x140c   : > { %v2589_v20 = vrot.slane %v2588_v19, 4 }
0x140e   : > { %v2590_v21 = vadd.f32 %v2589_v20, %v2588_v19 }
0x1410   : > { %v2591_v25 = vrot.slane %v2590_v21, 2 }
0x1412   : > { %v2592_v26 = vadd.f32 %v2591_v25, %v2590_v21 }
0x1414   : > { %v2593_v31 = vrot.slane %v2592_v26, 1 }
0x1416   : > { %v2594_v22 = vadd.f32 %v2593_v31, %v2592_v26 }
0x1418   : > { %v2596_v23 = vmul.f32 0.0625, %v2594_v22 }
0x141a   : > { %v2599_v38 = vsel %vm833_vm2, %v2596_v23, 0.0 }
0x141b   : > { %2600 = vadd.xlane.f32.xlu1 %v2599_v38 }
0x14a8   : > { %v2601_v40 = vpop.xlane.xlu1 %2600 }
0x14a9   : > { %v2602_v41 = vmul.f32 0.03125, %v2601_v40 }
0x14ab   : > { %v2603_v44 = vsub.f32 %v2596_v23, %v2602_v41 }
0x14ad   : > { %v2604_v24 = vmul.f32 %v2603_v44, %v2603_v44 }
0x14af   : > { %v2605_v45 = vsel %vm833_vm2, %v2604_v24, 0.0 }
0x14b0   : > { %2606 = vadd.xlane.f32.xlu1 %v2605_v45 }
0x153d   : > { %v2607_v34 = vpop.xlane.xlu1 %2606 }
0x153e   : > { %v2608_v35 = vmul.f32 0.03125, %v2607_v34 }
0x1540   : > { %v2609_v36 = vadd.f32 1e-05, %v2608_v35 }
0x1542   : > { %3559 = vrsqrt.f32 %v2609_v36 }
0x154c   : > { %v3560_v16 = vpop.eup %3559 }
0x154d   : > { %v2611_v39 = vmul.f32 %v3560_v16, %v2603_v44 }
0x154f   : > { %v2612_v43 = vmul.f32 %v2611_v39, %v2597_v37 }
0x1551   : > { %v2613_v46 = vadd.f32 %v2612_v43, %v2598_v42 }
0x1553   : > { %3270 = vmatmul.mubr.msk.f32.vlgmr.msra.gmra.mrb[24].mxu1 %vm833_vm2, %v2613_v46 }
0x1554   : > { %3280 = vmatprep.mubr.msk.f32.mxu1 %vm3638_vm6, %v3639_v52  ;;  %3403 = vmatpush3.bf16.msra.mxu1 %v3402_v11 }
0x1555   : > { %3404 = vmatprep.subr.bf16.mxu1 %v3637_v29 }
0x1558   : > { %3406 = vmatpush3.bf16.msra.mxu1 %v3405_v51 }
0x1626   : > { %v2688_v55 = vpop.f32.mrb[24].mxu1 }
0x1627   : > { %v2689_v56 = vadd.f32 %v2688_v55, %v2618_v54  ;;  %v3271_v57 = vpop.f32.mrb[25].mxu1 }
0x1629   : > { %v2693_v58 = vmul.f32 0.044715, %v2689_v56  ;;  %v2692_v0 = vmul.f32 0.5, %v2689_v56 }
0x162b   : > { %v2694_v59 = vmul.f32 %v2693_v58, %v2689_v56 }
0x162d   : > { %v2695_v60 = vmul.f32 %v2694_v59, %v2689_v56 }
0x162f   : > { %v2696_v61 = vadd.f32 %v2695_v60, %v2689_v56 }
0x1631   : > { %v2697_v62 = vmul.f32 0.7978846, %v2696_v61 }
0x1633   : > { %3561 = vtanh.f32 %v2697_v62 }
0x163d   : > { %v3562_v63 = vpop.eup %3561 }
0x163e   : > { %v2699_v1 = vadd.f32 1.0, %v3562_v63 }
0x1640   : > { %v2700_v2 = vmul.f32 %v2699_v1, %v2692_v0 }
0x1642   : > { %3281 = vmatmul.mubr.msk.f32.vlgmr.msra.gmra.mrb[26].mxu1 %vm833_vm2, %v2700_v2 }
0x1715   : > { %v2775_v4 = vpop.f32.mrb[26].mxu1 }
0x1716   : > { %v2776_v5 = vadd.f32 %v2775_v4, %v2705_v3  ;;  %v3282_v6 = vpop.f32.mrb[27].mxu1 }
0x1718   : > { %2780 = vst.msk [vmem:[%s702_s25] sm:$0x1] %vm2779_vm7, %v2776_v5 }
0x1719   : > { %3584 = shalt.err (!%p3581_p3)
}
0x171a   : > { %s3585_s24 = scalar_lea.hbm %s4293_s1, 16  ;;  %s3589_s23 = scalar_lea.hbm %s4409_s2, 32 }
0x171b   : > { %p3586_p4 = scmp.ne.s32.totalorder %s4293_s1, %s3585_s24  ;;  %p3590_p9 = scmp.lt.u32.totalorder %s4293_s1, %s4409_s2 }
0x171c   : > { %p3591_p10 = scmp.lt.u32.totalorder %s3589_s23, %s3585_s24  ;;  %p3593_p12 = scmp.lt.u32.totalorder %s3585_s24, %s4293_s1 }
0x171d   : > { %p3587_p7 = pnand %p3586_p4, %p3799_p5 }
0x171e   : > { %p3592_p11 = por %p3591_p10, %p3590_p9 }
0x171f   : > { %p3588_p8 = pneg %p3587_p7 }
0x1720   : > { %p3594_p13 = por %p3593_p12, %p3592_p11 }
0x1722   : > { %p3595_p0 = pnand %p3594_p13, %p3588_p8 }
0x1724   : > { %3598 = shalt.err (!%p3595_p0)
}
0x1725   : > { %3407 = dma.vmem_to_hbm [thread:$0]  (%p3799_p5), %s4295_s22, 16, %s4293_s1, %s2782_s4  }
0x1726 PF: > { %s4410_s6 = sld [smem:[#allocation7_spill]]  ;;  %s4411_s0 = sld [smem:[#allocation5_spill]] }
0x172c   : > { %p3413_p1 = scmp.ge.s32.totalorder %s4410_s6, 2  ;;  %s2806_s29 = sand.u32 1, %s4411_s0  }
0x172d   : > { %s2807_s25 = scalar_lea.sflag [#allocation3], %s2806_s29 }
0x172e   : > { %p3410_p2 = pnand %p3413_p1, %p3803_p6 }
0x1730   : > { %3616 = dma.done.wait (!%p3410_p2), %s2807_s25, 16  }
0x1731   : > { %3618 = vsyncadd (!%p3410_p2), %s2807_s25, 4294967280  ;;  %s4413_s25 = sld [smem:[#allocation8_spill]]  ;;  %s4414_s24 = sld [smem:[#allocation6_spill]] }
0x1732   : > { %s4415_s23 = sld [smem:[#allocation9_spill]]  ;;  %s4416_s4 = smov %s3625_s30 }
0x1737   : > { %p33_p3 = scmp.ge.s32.totalorder %s4413_s25, 4   ;;  %s4417_s30 = smov %s4414_s24 }
0x1738   : > { %s4418_s24 = smov %s4415_s23 }
0x1739   :  { %35 = sbr.rel (!%p33_p3) target bundleno = 14 (0xe), region = 159 }
0x1740   :  { %2811 = vsyncpa [#allocation3], 1 }
0x1741   :  { %2813 = vsyncpa [#allocation3 + $0x1], 1 }

</bundles_post_ra>
